<compile_context>
chip_gen: v7x
topology: tpu7x:2x2x1
jax: 0.10.0
libtpu: 0.0.40
codegen_flags: <defaults>
</compile_context>

<pallas_src>
import functools

import jax
import jax.numpy as jnp
import numpy as np
from jax import lax
from jax.experimental import pallas as pl
from jax.experimental.pallas import tpu as pltpu


def _make_divisible(v, divisor, min_value=None):
    if min_value is None:
        min_value = divisor
    new_v = max(min_value, int(v + divisor / 2) // divisor * divisor)
    if new_v < 0.9 * v:
        new_v += divisor
    return new_v


def _split_attention_kernel(xpad_ref, wconv_ref, w1_ref, b1_ref, w2_ref, b2_ref,
                            out_ref, patches_ref, conv_ref, *,
                            H, W, KH, KW, Cin, radix, groups, out_channels,
                            compute_dtype):
    """Per-image kernel: grouped conv (single large-K MXU matmul over an im2col
    scratch with block-diagonal weights) + ReLU, radix-sum GAP (MXU ones-row
    matmul), fc1/ReLU/fc2, radix softmax, weighted radix sum."""
    HW = H * W
    C = out_channels
    cpg = C // groups

    # -- Phase 1: im2col into VMEM scratch (tap-major: col = tap*Cin + ci). ----
    # Only KH*KW full-channel window slices; cast to compute dtype (bf16) once,
    # at scratch-store time.
    for kh in range(KH):
        for kw in range(KW):
            tap = kh * KW + kw
            patch = xpad_ref[pl.ds(kh, H), pl.ds(kw, W), pl.ds(0, Cin)]
            patches_ref[pl.ds(0, HW), pl.ds(tap * Cin, Cin)] = (
                patch.reshape(HW, Cin).astype(compute_dtype))

    # -- Phase 2: entire grouped conv as ONE large-K matmul (f32 accum) --------
    # wconv_ref is the block-diagonal (KH*KW*Cin, mid_chs) operand built in the
    # wrapper, so every group is handled by this single MXU matmul.
    conv_ref[...] = jnp.maximum(
        jnp.dot(patches_ref[...], wconv_ref[...],
                preferred_element_type=jnp.float32), 0.0)            # (HW, mid)

    # -- Phase 3: global average pool on the MXU + radix sum -------------------
    ones_row = jnp.full((1, HW), 1.0 / HW, dtype=jnp.float32)
    gap_all = jnp.dot(ones_row, conv_ref[...],
                      preferred_element_type=jnp.float32)            # (1, mid)
    gap = gap_all[:, 0:C]
    for r in range(1, radix):
        gap = gap + gap_all[:, r * C:(r + 1) * C]                    # (1, C)

    # -- Phase 4: fc1 + ReLU + fc2 (block-diagonal dense weights, f32) ---------
    # TODO(synk): batch these M=1 matmuls across images when B is large.
    h1 = jnp.maximum(
        jnp.dot(gap, w1_ref[...], preferred_element_type=jnp.float32)
        + b1_ref[...], 0.0)                                          # (1, A)
    a = (jnp.dot(h1, w2_ref[...], preferred_element_type=jnp.float32)
         + b2_ref[...])                                              # (1, mid)

    # -- Phase 5: radix softmax (RSoftmax), kept in f32 -------------------------
    if radix > 1:
        # fc2 output channel = g*(radix*cpg) + r*cpg + j ; softmax over r per (g, j)
        soft = []
        for g in range(groups):
            vals = [a[:, (g * radix + r) * cpg:(g * radix + r + 1) * cpg]
                    for r in range(radix)]
            m = vals[0]
            for r in range(1, radix):
                m = jnp.maximum(m, vals[r])
            exps = [jnp.exp(v - m) for v in vals]
            s = exps[0]
            for r in range(1, radix):
                s = s + exps[r]
            soft.append([e / s for e in exps])
        # attention for radix r, channel order c = g*cpg + j
        attn = [jnp.concatenate([soft[g][r] for g in range(groups)], axis=-1)
                for r in range(radix)]                               # each (1, C)
    else:
        attn = [jax.nn.sigmoid(a)]                                   # (1, C)

    # -- Phase 6: weighted radix sum, store NHWC --------------------------------
    out = conv_ref[pl.ds(0, HW), pl.ds(0, C)] * attn[0]
    for r in range(1, radix):
        out = out + conv_ref[pl.ds(0, HW), pl.ds(r * C, C)] * attn[r]
    # TODO(synk): for realistic shapes present a lane-dense (H, W*C) output slab;
    # this (H, W, C) store is relayout-free but lane-masked when C is small.
    out_ref[...] = out.reshape(H, W, C).astype(out_ref.dtype)


def _grouped_1x1_to_dense(w2d, groups):
    """Grouped 1x1-conv weight (out_ch, in_ch//groups) -> dense block-diagonal
    matmul operand of shape (in_ch, out_ch)."""
    out_ch, in_g = w2d.shape
    out_g = out_ch // groups
    blocks = w2d.reshape(groups, out_g, in_g)
    dense = jnp.zeros((groups, in_g, groups, out_g), w2d.dtype)
    for g in range(groups):
        dense = dense.at[g, :, g, :].set(jnp.transpose(blocks[g], (1, 0)))
    return dense.reshape(groups * in_g, out_ch)


def _grouped_conv_to_dense(wconv, G, compute_dtype):
    """Grouped conv weight (mid, cin_g, KH, KW) -> block-diagonal dense operand
    of shape (KH*KW*Cin, mid) matching tap-major im2col columns."""
    mid, cin_g, KH, KW = wconv.shape
    cout_g = mid // G
    w_t = jnp.transpose(wconv.reshape(G, cout_g, cin_g, KH, KW), (3, 4, 0, 2, 1))
    w_taps = w_t.reshape(KH * KW, G, cin_g, cout_g)
    dense = jnp.zeros((KH * KW, G, cin_g, G, cout_g), wconv.dtype)
    for g in range(G):
        dense = dense.at[:, g, :, g, :].set(w_taps[:, g])
    return dense.reshape(KH * KW * G * cin_g, G * cout_g).astype(compute_dtype)


def split_attention_forward(x_nchw, params, *, radix, groups, padding,
                            compute_dtype=jnp.bfloat16):
    """Pallas-backed SplitAttention forward. x_nchw: (B, Cin, H, W). Returns NCHW."""
    B, Cin, H, W = x_nchw.shape
    wconv, w1, b1, w2, b2 = (params["conv_w"], params["fc1_w"], params["fc1_b"],
                             params["fc2_w"], params["fc2_b"])
    mid_chs, cin_g, KH, KW = wconv.shape
    G = groups * radix
    out_channels = mid_chs // radix
    attn_chs = w1.shape[0]
    assert Cin % G == 0 and Cin // G == cin_g, (Cin, G, cin_g)
    assert mid_chs % G == 0 and out_channels % groups == 0
    assert attn_chs % groups == 0

    # --- layout glue (XLA): NCHW -> NHWC + spatial zero pad for the halo ------
    # TODO(synk): accept NHWC / handle the halo in-kernel for production use.
    x_nhwc = jnp.transpose(x_nchw, (0, 2, 3, 1))
    xpad = jnp.pad(x_nhwc, ((0, 0), (padding, padding), (padding, padding), (0, 0)))
    Hp, Wp = H + 2 * padding, W + 2 * padding
    HW = H * W
    K_full = KH * KW * Cin

    # --- weights: casts hoisted out of the kernel, block-diagonal dense forms --
    wconv_d = _grouped_conv_to_dense(wconv, G, compute_dtype)          # (K_full, mid)
    w1_d = _grouped_1x1_to_dense(
        w1.reshape(attn_chs, out_channels // groups), groups).astype(jnp.float32)   # (C, A)
    w2_d = _grouped_1x1_to_dense(
        w2.reshape(mid_chs, attn_chs // groups), groups).astype(jnp.float32)        # (A, mid)
    b1_r = b1.reshape(1, attn_chs).astype(jnp.float32)
    b2_r = b2.reshape(1, mid_chs).astype(jnp.float32)

    kernel = functools.partial(
        _split_attention_kernel, H=H, W=W, KH=KH, KW=KW, Cin=Cin,
        radix=radix, groups=groups, out_channels=out_channels,
        compute_dtype=compute_dtype)

    # --- explicit VMEM budget (double-buffered I/O + scratch) ------------------
    in_b = xpad.dtype.itemsize
    cd_b = jnp.dtype(compute_dtype).itemsize
    est = (2 * Hp * Wp * Cin * in_b                       # xpad tile
           + 2 * HW * out_channels * in_b                 # output tile
           + 2 * (K_full * mid_chs * cd_b                 # conv weight
                  + 4 * (out_channels * attn_chs + attn_chs
                         + attn_chs * mid_chs + mid_chs))  # fc weights/biases
           + HW * K_full * cd_b                           # im2col scratch
           + HW * mid_chs * 4)                            # conv scratch (f32)
    vmem_limit = int(min(max(2 * est + (4 << 20), 32 << 20), 60 << 20))

    out_nhwc = pl.pallas_call(
        kernel,
        out_shape=jax.ShapeDtypeStruct((B, H, W, out_channels), x_nchw.dtype),
        grid=(B,),
        in_specs=[
            pl.BlockSpec((None, Hp, Wp, Cin), lambda b: (b, 0, 0, 0)),
            pl.BlockSpec((K_full, mid_chs), lambda b: (0, 0)),
            pl.BlockSpec((out_channels, attn_chs), lambda b: (0, 0)),
            pl.BlockSpec((1, attn_chs), lambda b: (0, 0)),
            pl.BlockSpec((attn_chs, mid_chs), lambda b: (0, 0)),
            pl.BlockSpec((1, mid_chs), lambda b: (0, 0)),
        ],
        out_specs=pl.BlockSpec((None, H, W, out_channels), lambda b: (b, 0, 0, 0)),
        scratch_shapes=[
            pltpu.VMEM((HW, K_full), compute_dtype),   # im2col patches
            pltpu.VMEM((HW, mid_chs), jnp.float32),    # conv output (post-ReLU)
        ],
        compiler_params=pltpu.CompilerParams(
            dimension_semantics=("parallel",),          # megacore sharding on v7x
            vmem_limit_bytes=vmem_limit),
    )(xpad, wconv_d, w1_d, b1_r, w2_d, b2_r)

    return jnp.transpose(out_nhwc, (0, 3, 1, 2))        # back to NCHW


def reference_forward(x_nchw, params, *, radix, groups, padding):
    """Pure-JAX reference reproducing the PyTorch forward (supports groups>1)."""
    wconv, w1, b1, w2, b2 = (params["conv_w"], params["fc1_w"], params["fc1_b"],
                             params["fc2_w"], params["fc2_b"])
    y = lax.conv_general_dilated(
        x_nchw, wconv, window_strides=(1, 1),
        padding=[(padding, padding), (padding, padding)],
        dimension_numbers=("NCHW", "OIHW", "NCHW"),
        feature_group_count=groups * radix)
    y = jnp.maximum(y, 0.0)
    B, RC, H, W = y.shape
    C = RC // radix
    if radix > 1:
        y5 = y.reshape(B, radix, C, H, W)
        x_gap = y5.sum(axis=1)
    else:
        x_gap = y
    gap = x_gap.mean(axis=(2, 3), keepdims=True)                    # (B, C, 1, 1)
    h1 = lax.conv_general_dilated(
        gap, w1, (1, 1), [(0, 0), (0, 0)],
        dimension_numbers=("NCHW", "OIHW", "NCHW"),
        feature_group_count=groups) + b1.reshape(1, -1, 1, 1)
    h1 = jnp.maximum(h1, 0.0)
    a = lax.conv_general_dilated(
        h1, w2, (1, 1), [(0, 0), (0, 0)],
        dimension_numbers=("NCHW", "OIHW", "NCHW"),
        feature_group_count=groups) + b2.reshape(1, -1, 1, 1)
    a = a.reshape(B, -1)
    if radix > 1:
        t = jnp.transpose(a.reshape(B, groups, radix, -1), (0, 2, 1, 3))
        attn = jax.nn.softmax(t, axis=1).reshape(B, -1)
        out = (y5 * attn.reshape(B, radix, C, 1, 1)).sum(axis=1)
    else:
        attn = jax.nn.sigmoid(a)
        out = y * attn.reshape(B, RC, 1, 1)
    return out


def _run_case(key, *, B, in_channels, H, W, radix, groups, kernel_size,
              compute_dtype, atol, rtol, tag):
    out_channels = in_channels
    padding = kernel_size // 2
    mid_chs = out_channels * radix
    attn_chs = _make_divisible(in_channels * radix * 0.25, min_value=32, divisor=8)
    G = groups * radix

    kx, k1, k2, k3, k4, k5 = jax.random.split(key, 6)
    x = jax.random.normal(kx, (B, in_channels, H, W), dtype=jnp.float32)
    params = {
        "conv_w": 0.1 * jax.random.normal(
            k1, (mid_chs, in_channels // G, kernel_size, kernel_size), dtype=jnp.float32),
        "fc1_w": 0.1 * jax.random.normal(
            k2, (attn_chs, out_channels // groups, 1, 1), dtype=jnp.float32),
        "fc1_b": 0.05 * jax.random.normal(k3, (attn_chs,), dtype=jnp.float32),
        "fc2_w": 0.1 * jax.random.normal(
            k4, (mid_chs, attn_chs // groups, 1, 1), dtype=jnp.float32),
        "fc2_b": 0.05 * jax.random.normal(k5, (mid_chs,), dtype=jnp.float32),
    }

    out = split_attention_forward(x, params, radix=radix, groups=groups,
                                  padding=padding, compute_dtype=compute_dtype)
    out = jax.block_until_ready(out)
    ref = reference_forward(x, params, radix=radix, groups=groups, padding=padding)
    assert out.shape == (B, out_channels, H, W), (tag, out.shape)
    err = float(np.max(np.abs(np.asarray(out) - np.asarray(ref))))
    assert np.allclose(np.asarray(out), np.asarray(ref), atol=atol, rtol=rtol), (tag, err)


if __name__ == "__main__":
    key = jax.random.PRNGKey(0)
    k_a, k_b = jax.random.split(key)
    # Default module config (radix=2, groups=1), exact f32 conv path (tight check).
    _run_case(k_a, B=2, in_channels=4, H=16, W=16, radix=2, groups=1,
              kernel_size=3, compute_dtype=jnp.float32, atol=1e-4, rtol=1e-4,
              tag="r2g1_f32")
    # Same config on the bf16 MXU fast path (looser tolerance; f32 accumulation).
    _run_case(k_a, B=2, in_channels=4, H=16, W=16, radix=2, groups=1,
              kernel_size=3, compute_dtype=jnp.bfloat16, atol=5e-2, rtol=5e-2,
              tag="r2g1_bf16")
    # Grouped config (radix=2, groups=2) exercising the block-diagonal fc weights
    # and the RSoftmax channel interleaving for groups > 1.
    _run_case(k_b, B=2, in_channels=8, H=8, W=8, radix=2, groups=2,
              kernel_size=3, compute_dtype=jnp.float32, atol=1e-4, rtol=1e-4,
              tag="r2g2_f32")
    print("KERNEL_OK")
</pallas_src>

<mosaic_0001>
module attributes {stable_mosaic.version = 11 : i64} {
  func.func @_split_attention_kernel(%arg0: i32, %arg1: memref<1x18x18x4xf32, #tpu.memory_space<vmem>>, %arg2: memref<36x8xf32, #tpu.memory_space<vmem>>, %arg3: memref<4x32xf32, #tpu.memory_space<vmem>>, %arg4: memref<1x32xf32, #tpu.memory_space<vmem>>, %arg5: memref<32x8xf32, #tpu.memory_space<vmem>>, %arg6: memref<1x8xf32, #tpu.memory_space<vmem>>, %arg7: memref<1x16x16x4xf32, #tpu.memory_space<vmem>>, %arg8: memref<256x36xf32, #tpu.memory_space<vmem>>, %arg9: memref<256x8xf32, #tpu.memory_space<vmem>>) attributes {dimension_semantics = [#tpu.dimension_semantics<parallel>], iteration_bounds = array<i64: 2>, scalar_prefetch = 0 : i64, scratch_operands = 2 : i64, tpu.core_type = #tpu.core_type<tc>, window_params = [{transform_indices = @transform_0, window_bounds = array<i64: 1, 18, 18, 4>}, {pipeline_mode = #tpu.pipeline_mode<synchronous>, transform_indices = @transform_1, window_bounds = array<i64: 36, 8>}, {pipeline_mode = #tpu.pipeline_mode<synchronous>, transform_indices = @transform_2, window_bounds = array<i64: 4, 32>}, {pipeline_mode = #tpu.pipeline_mode<synchronous>, transform_indices = @transform_3, window_bounds = array<i64: 1, 32>}, {pipeline_mode = #tpu.pipeline_mode<synchronous>, transform_indices = @transform_4, window_bounds = array<i64: 32, 8>}, {pipeline_mode = #tpu.pipeline_mode<synchronous>, transform_indices = @transform_5, window_bounds = array<i64: 1, 8>}, {transform_indices = @transform_6, window_bounds = array<i64: 1, 16, 16, 4>}]} {
    %c0 = arith.constant 0 : index
    %c0_0 = arith.constant 0 : index
    %c0_1 = arith.constant 0 : index
    %c0_2 = arith.constant 0 : index
    %0 = vector.load %arg1[%c0, %c0_0, %c0_1, %c0_2] : memref<1x18x18x4xf32, #tpu.memory_space<vmem>>, vector<1x16x16x4xf32>
    %1 = vector.shape_cast %0 : vector<1x16x16x4xf32> to vector<16x16x4xf32>
    %2 = vector.shape_cast %1 : vector<16x16x4xf32> to vector<256x4xf32>
    %c0_3 = arith.constant 0 : index
    %c0_4 = arith.constant 0 : index
    %3 = vector.load %arg8[%c0_3, %c0_4] : memref<256x36xf32, #tpu.memory_space<vmem>>, vector<256x4xf32>
    tpu.vector_store %arg8[%c0_3, %c0_4], %2 {strides = array<i32>} : memref<256x36xf32, #tpu.memory_space<vmem>>, vector<256x4xf32>,
    %c0_5 = arith.constant 0 : index
    %c0_6 = arith.constant 0 : index
    %c1 = arith.constant 1 : index
    %c0_7 = arith.constant 0 : index
    %4 = vector.load %arg1[%c0_5, %c0_6, %c1, %c0_7] : memref<1x18x18x4xf32, #tpu.memory_space<vmem>>, vector<1x16x16x4xf32>
    %5 = vector.shape_cast %4 : vector<1x16x16x4xf32> to vector<16x16x4xf32>
    %6 = vector.shape_cast %5 : vector<16x16x4xf32> to vector<256x4xf32>
    %c0_8 = arith.constant 0 : index
    %c4 = arith.constant 4 : index
    %7 = vector.load %arg8[%c0_8, %c4] : memref<256x36xf32, #tpu.memory_space<vmem>>, vector<256x4xf32>
    tpu.vector_store %arg8[%c0_8, %c4], %6 {strides = array<i32>} : memref<256x36xf32, #tpu.memory_space<vmem>>, vector<256x4xf32>,
    %c0_9 = arith.constant 0 : index
    %c0_10 = arith.constant 0 : index
    %c2 = arith.constant 2 : index
    %c0_11 = arith.constant 0 : index
    %8 = vector.load %arg1[%c0_9, %c0_10, %c2, %c0_11] : memref<1x18x18x4xf32, #tpu.memory_space<vmem>>, vector<1x16x16x4xf32>
    %9 = vector.shape_cast %8 : vector<1x16x16x4xf32> to vector<16x16x4xf32>
    %10 = vector.shape_cast %9 : vector<16x16x4xf32> to vector<256x4xf32>
    %c0_12 = arith.constant 0 : index
    %c8 = arith.constant 8 : index
    %11 = vector.load %arg8[%c0_12, %c8] : memref<256x36xf32, #tpu.memory_space<vmem>>, vector<256x4xf32>
    tpu.vector_store %arg8[%c0_12, %c8], %10 {strides = array<i32>} : memref<256x36xf32, #tpu.memory_space<vmem>>, vector<256x4xf32>,
    %c0_13 = arith.constant 0 : index
    %c1_14 = arith.constant 1 : index
    %c0_15 = arith.constant 0 : index
    %c0_16 = arith.constant 0 : index
    %12 = vector.load %arg1[%c0_13, %c1_14, %c0_15, %c0_16] : memref<1x18x18x4xf32, #tpu.memory_space<vmem>>, vector<1x16x16x4xf32>
    %13 = vector.shape_cast %12 : vector<1x16x16x4xf32> to vector<16x16x4xf32>
    %14 = vector.shape_cast %13 : vector<16x16x4xf32> to vector<256x4xf32>
    %c0_17 = arith.constant 0 : index
    %c12 = arith.constant 12 : index
    %15 = vector.load %arg8[%c0_17, %c12] : memref<256x36xf32, #tpu.memory_space<vmem>>, vector<256x4xf32>
    tpu.vector_store %arg8[%c0_17, %c12], %14 {strides = array<i32>} : memref<256x36xf32, #tpu.memory_space<vmem>>, vector<256x4xf32>,
    %c0_18 = arith.constant 0 : index
    %c1_19 = arith.constant 1 : index
    %c1_20 = arith.constant 1 : index
    %c0_21 = arith.constant 0 : index
    %16 = vector.load %arg1[%c0_18, %c1_19, %c1_20, %c0_21] : memref<1x18x18x4xf32, #tpu.memory_space<vmem>>, vector<1x16x16x4xf32>
    %17 = vector.shape_cast %16 : vector<1x16x16x4xf32> to vector<16x16x4xf32>
    %18 = vector.shape_cast %17 : vector<16x16x4xf32> to vector<256x4xf32>
    %c0_22 = arith.constant 0 : index
    %c16 = arith.constant 16 : index
    %19 = vector.load %arg8[%c0_22, %c16] : memref<256x36xf32, #tpu.memory_space<vmem>>, vector<256x4xf32>
    tpu.vector_store %arg8[%c0_22, %c16], %18 {strides = array<i32>} : memref<256x36xf32, #tpu.memory_space<vmem>>, vector<256x4xf32>,
    %c0_23 = arith.constant 0 : index
    %c1_24 = arith.constant 1 : index
    %c2_25 = arith.constant 2 : index
    %c0_26 = arith.constant 0 : index
    %20 = vector.load %arg1[%c0_23, %c1_24, %c2_25, %c0_26] : memref<1x18x18x4xf32, #tpu.memory_space<vmem>>, vector<1x16x16x4xf32>
    %21 = vector.shape_cast %20 : vector<1x16x16x4xf32> to vector<16x16x4xf32>
    %22 = vector.shape_cast %21 : vector<16x16x4xf32> to vector<256x4xf32>
    %c0_27 = arith.constant 0 : index
    %c20 = arith.constant 20 : index
    %23 = vector.load %arg8[%c0_27, %c20] : memref<256x36xf32, #tpu.memory_space<vmem>>, vector<256x4xf32>
    tpu.vector_store %arg8[%c0_27, %c20], %22 {strides = array<i32>} : memref<256x36xf32, #tpu.memory_space<vmem>>, vector<256x4xf32>,
    %c0_28 = arith.constant 0 : index
    %c2_29 = arith.constant 2 : index
    %c0_30 = arith.constant 0 : index
    %c0_31 = arith.constant 0 : index
    %24 = vector.load %arg1[%c0_28, %c2_29, %c0_30, %c0_31] : memref<1x18x18x4xf32, #tpu.memory_space<vmem>>, vector<1x16x16x4xf32>
    %25 = vector.shape_cast %24 : vector<1x16x16x4xf32> to vector<16x16x4xf32>
    %26 = vector.shape_cast %25 : vector<16x16x4xf32> to vector<256x4xf32>
    %c0_32 = arith.constant 0 : index
    %c24 = arith.constant 24 : index
    %27 = vector.load %arg8[%c0_32, %c24] : memref<256x36xf32, #tpu.memory_space<vmem>>, vector<256x4xf32>
    tpu.vector_store %arg8[%c0_32, %c24], %26 {strides = array<i32>} : memref<256x36xf32, #tpu.memory_space<vmem>>, vector<256x4xf32>,
    %c0_33 = arith.constant 0 : index
    %c2_34 = arith.constant 2 : index
    %c1_35 = arith.constant 1 : index
    %c0_36 = arith.constant 0 : index
    %28 = vector.load %arg1[%c0_33, %c2_34, %c1_35, %c0_36] : memref<1x18x18x4xf32, #tpu.memory_space<vmem>>, vector<1x16x16x4xf32>
    %29 = vector.shape_cast %28 : vector<1x16x16x4xf32> to vector<16x16x4xf32>
    %30 = vector.shape_cast %29 : vector<16x16x4xf32> to vector<256x4xf32>
    %c0_37 = arith.constant 0 : index
    %c28 = arith.constant 28 : index
    %31 = vector.load %arg8[%c0_37, %c28] : memref<256x36xf32, #tpu.memory_space<vmem>>, vector<256x4xf32>
    tpu.vector_store %arg8[%c0_37, %c28], %30 {strides = array<i32>} : memref<256x36xf32, #tpu.memory_space<vmem>>, vector<256x4xf32>,
    %c0_38 = arith.constant 0 : index
    %c2_39 = arith.constant 2 : index
    %c2_40 = arith.constant 2 : index
    %c0_41 = arith.constant 0 : index
    %32 = vector.load %arg1[%c0_38, %c2_39, %c2_40, %c0_41] : memref<1x18x18x4xf32, #tpu.memory_space<vmem>>, vector<1x16x16x4xf32>
    %33 = vector.shape_cast %32 : vector<1x16x16x4xf32> to vector<16x16x4xf32>
    %34 = vector.shape_cast %33 : vector<16x16x4xf32> to vector<256x4xf32>
    %c0_42 = arith.constant 0 : index
    %c32 = arith.constant 32 : index
    %35 = vector.load %arg8[%c0_42, %c32] : memref<256x36xf32, #tpu.memory_space<vmem>>, vector<256x4xf32>
    tpu.vector_store %arg8[%c0_42, %c32], %34 {strides = array<i32>} : memref<256x36xf32, #tpu.memory_space<vmem>>, vector<256x4xf32>,
    %c0_43 = arith.constant 0 : index
    %c0_44 = arith.constant 0 : index
    %36 = vector.load %arg8[%c0_43, %c0_44] : memref<256x36xf32, #tpu.memory_space<vmem>>, vector<256x36xf32>
    %c0_45 = arith.constant 0 : index
    %c0_46 = arith.constant 0 : index
    %37 = vector.load %arg2[%c0_45, %c0_46] : memref<36x8xf32, #tpu.memory_space<vmem>>, vector<36x8xf32>
    %cst = arith.constant dense<0.000000e+00> : vector<256x8xf32>
    %38 = tpu.matmul %36, %37, %cst {dimension_numbers = #tpu.dot_dimension_numbers<[1], [0], [0], [1], [0, 0, 1, 1], [], []>} : vector<256x36xf32>, vector<36x8xf32>, vector<256x8xf32> -> vector<256x8xf32>
    %cst_47 = arith.constant 0.000000e+00 : f32
    %39 = vector.broadcast %cst_47 : f32 to vector<256x8xf32>
    %40 = arith.maximumf %38, %39 : vector<256x8xf32>
    %c0_48 = arith.constant 0 : index
    %c0_49 = arith.constant 0 : index
    %41 = vector.load %arg9[%c0_48, %c0_49] : memref<256x8xf32, #tpu.memory_space<vmem>>, vector<256x8xf32>
    tpu.vector_store %arg9[%c0_48, %c0_49], %40 {strides = array<i32>} : memref<256x8xf32, #tpu.memory_space<vmem>>, vector<256x8xf32>,
    %cst_50 = arith.constant 3.906250e-03 : f32
    %42 = vector.broadcast %cst_50 : f32 to vector<1x256xf32>
    %c0_51 = arith.constant 0 : index
    %c0_52 = arith.constant 0 : index
    %43 = vector.load %arg9[%c0_51, %c0_52] : memref<256x8xf32, #tpu.memory_space<vmem>>, vector<256x8xf32>
    %cst_53 = arith.constant dense<0.000000e+00> : vector<1x8xf32>
    %44 = tpu.matmul %42, %43, %cst_53 {dimension_numbers = #tpu.dot_dimension_numbers<[1], [0], [0], [1], [0, 0, 1, 1], [], []>} : vector<1x256xf32>, vector<256x8xf32>, vector<1x8xf32> -> vector<1x8xf32>
    %45 = vector.extract_strided_slice %44 {offsets = [0, 0], sizes = [1, 4], strides = [1, 1]} : vector<1x8xf32> to vector<1x4xf32>
    %46 = vector.extract_strided_slice %44 {offsets = [0, 4], sizes = [1, 4], strides = [1, 1]} : vector<1x8xf32> to vector<1x4xf32>
    %47 = arith.addf %45, %46 : vector<1x4xf32>
    %c0_54 = arith.constant 0 : index
    %c0_55 = arith.constant 0 : index
    %48 = vector.load %arg3[%c0_54, %c0_55] : memref<4x32xf32, #tpu.memory_space<vmem>>, vector<4x32xf32>
    %cst_56 = arith.constant dense<0.000000e+00> : vector<1x32xf32>
    %49 = tpu.matmul %47, %48, %cst_56 {dimension_numbers = #tpu.dot_dimension_numbers<[1], [0], [0], [1], [0, 0, 1, 1], [], []>} : vector<1x4xf32>, vector<4x32xf32>, vector<1x32xf32> -> vector<1x32xf32>
    %c0_57 = arith.constant 0 : index
    %c0_58 = arith.constant 0 : index
    %50 = vector.load %arg4[%c0_57, %c0_58] : memref<1x32xf32, #tpu.memory_space<vmem>>, vector<1x32xf32>
    %51 = arith.addf %49, %50 : vector<1x32xf32>
    %cst_59 = arith.constant 0.000000e+00 : f32
    %52 = vector.broadcast %cst_59 : f32 to vector<1x32xf32>
    %53 = arith.maximumf %51, %52 : vector<1x32xf32>
    %c0_60 = arith.constant 0 : index
    %c0_61 = arith.constant 0 : index
    %54 = vector.load %arg5[%c0_60, %c0_61] : memref<32x8xf32, #tpu.memory_space<vmem>>, vector<32x8xf32>
    %cst_62 = arith.constant dense<0.000000e+00> : vector<1x8xf32>
    %55 = tpu.matmul %53, %54, %cst_62 {dimension_numbers = #tpu.dot_dimension_numbers<[1], [0], [0], [1], [0, 0, 1, 1], [], []>} : vector<1x32xf32>, vector<32x8xf32>, vector<1x8xf32> -> vector<1x8xf32>
    %c0_63 = arith.constant 0 : index
    %c0_64 = arith.constant 0 : index
    %56 = vector.load %arg6[%c0_63, %c0_64] : memref<1x8xf32, #tpu.memory_space<vmem>>, vector<1x8xf32>
    %57 = arith.addf %55, %56 : vector<1x8xf32>
    %58 = vector.extract_strided_slice %57 {offsets = [0, 0], sizes = [1, 4], strides = [1, 1]} : vector<1x8xf32> to vector<1x4xf32>
    %59 = vector.extract_strided_slice %57 {offsets = [0, 4], sizes = [1, 4], strides = [1, 1]} : vector<1x8xf32> to vector<1x4xf32>
    %60 = arith.maximumf %58, %59 : vector<1x4xf32>
    %61 = arith.subf %58, %60 : vector<1x4xf32>
    %62 = math.exp %61 : vector<1x4xf32>
    %63 = arith.subf %59, %60 : vector<1x4xf32>
    %64 = math.exp %63 : vector<1x4xf32>
    %65 = arith.addf %62, %64 : vector<1x4xf32>
    %66 = arith.divf %62, %65 : vector<1x4xf32>
    %67 = arith.divf %64, %65 : vector<1x4xf32>
    %c0_65 = arith.constant 0 : index
    %c0_66 = arith.constant 0 : index
    %68 = vector.load %arg9[%c0_65, %c0_66] : memref<256x8xf32, #tpu.memory_space<vmem>>, vector<256x4xf32>
    %69 = vector.broadcast %66 : vector<1x4xf32> to vector<256x4xf32>
    %70 = arith.mulf %68, %69 : vector<256x4xf32>
    %c0_67 = arith.constant 0 : index
    %c4_68 = arith.constant 4 : index
    %71 = vector.load %arg9[%c0_67, %c4_68] : memref<256x8xf32, #tpu.memory_space<vmem>>, vector<256x4xf32>
    %72 = vector.broadcast %67 : vector<1x4xf32> to vector<256x4xf32>
    %73 = arith.mulf %71, %72 : vector<256x4xf32>
    %74 = arith.addf %70, %73 : vector<256x4xf32>
    %75 = vector.shape_cast %74 : vector<256x4xf32> to vector<16x16x4xf32>
    %c0_69 = arith.constant 0 : index
    %c0_70 = arith.constant 0 : index
    %c0_71 = arith.constant 0 : index
    %c0_72 = arith.constant 0 : index
    %76 = vector.load %arg7[%c0_69, %c0_70, %c0_71, %c0_72] : memref<1x16x16x4xf32, #tpu.memory_space<vmem>>, vector<1x16x16x4xf32>
    %77 = vector.shape_cast %76 : vector<1x16x16x4xf32> to vector<16x16x4xf32>
    %78 = vector.shape_cast %75 : vector<16x16x4xf32> to vector<1x16x16x4xf32>
    tpu.vector_store %arg7[%c0_69, %c0_70, %c0_71, %c0_72], %78 {strides = array<i32>} : memref<1x16x16x4xf32, #tpu.memory_space<vmem>>, vector<1x16x16x4xf32>,
    return
  }
  func.func @transform_0(%arg0: i32) -> (i32, i32, i32, i32) {
    %c0_i32 = arith.constant 0 : i32
    %c0_i32_0 = arith.constant 0 : i32
    %c0_i32_1 = arith.constant 0 : i32
    %c0_i32_2 = arith.constant 0 : i32
    return %arg0, %c0_i32, %c0_i32_0, %c0_i32_1 : i32, i32, i32, i32
  }
  func.func @transform_1(%arg0: i32) -> (i32, i32) {
    %c0_i32 = arith.constant 0 : i32
    %c0_i32_0 = arith.constant 0 : i32
    %c0_i32_1 = arith.constant 0 : i32
    return %c0_i32, %c0_i32_0 : i32, i32
  }
  func.func @transform_2(%arg0: i32) -> (i32, i32) {
    %c0_i32 = arith.constant 0 : i32
    %c0_i32_0 = arith.constant 0 : i32
    %c0_i32_1 = arith.constant 0 : i32
    return %c0_i32, %c0_i32_0 : i32, i32
  }
  func.func @transform_3(%arg0: i32) -> (i32, i32) {
    %c0_i32 = arith.constant 0 : i32
    %c0_i32_0 = arith.constant 0 : i32
    %c0_i32_1 = arith.constant 0 : i32
    return %c0_i32, %c0_i32_0 : i32, i32
  }
  func.func @transform_4(%arg0: i32) -> (i32, i32) {
    %c0_i32 = arith.constant 0 : i32
    %c0_i32_0 = arith.constant 0 : i32
    %c0_i32_1 = arith.constant 0 : i32
    return %c0_i32, %c0_i32_0 : i32, i32
  }
  func.func @transform_5(%arg0: i32) -> (i32, i32) {
    %c0_i32 = arith.constant 0 : i32
    %c0_i32_0 = arith.constant 0 : i32
    %c0_i32_1 = arith.constant 0 : i32
    return %c0_i32, %c0_i32_0 : i32, i32
  }
  func.func @transform_6(%arg0: i32) -> (i32, i32, i32, i32) {
    %c0_i32 = arith.constant 0 : i32
    %c0_i32_0 = arith.constant 0 : i32
    %c0_i32_1 = arith.constant 0 : i32
    %c0_i32_2 = arith.constant 0 : i32
    return %arg0, %c0_i32, %c0_i32_0, %c0_i32_1 : i32, i32, i32, i32
  }
}

</mosaic_0001>

<bundles_post_ra>
// kernel: tpu_custom_call.1
= control target key start
LH: loop header
LB: loop body
LE: loop exit
PB: predicated region body
PF: predicated region fallthrough
CT: control target
= control target key end

     0   :  { %s3427_s21 = smov 0   ;;  %s4647_s0 = inlined_call_operand.vmem [shape: f32[2,18,18,4], index: 0, kind: input, shape index: {}]   ;;  %s4648_s1 = inlined_call_operand.vmem [shape: f32[36,8], index: 1, kind: input, shape index: {}]   ;;  %s4649_s2 = inlined_call_operand.vmem [shape: f32[4,32], index: 2, kind: input, shape index: {}]   ;;  %s4650_s3 = inlined_call_operand.vmem [shape: f32[1,32], index: 3, kind: input, shape index: {}]   ;;  %s4651_s4 = inlined_call_operand.vmem [shape: f32[32,8], index: 4, kind: input, shape index: {}]   ;;  %s4652_s5 = inlined_call_operand.vmem [shape: f32[1,8], index: 5, kind: input, shape index: {}]   ;;  %s4653_s6 = inlined_call_operand.vmem [shape: f32[2,16,16,4], index: 6, kind: output, shape index: {}]  }
   0x1 LB: > { %s2903_s22 = sadd.s32 4294967295, %s3377_s21   ;;  %p2907_p0 = scmp.ge.s32.totalorder %s3377_s21, 1  ;;  %s3377_s21 = sphi %s3427_s21, %s16_s21  }
   0x2   : > { %p212_p1 = scmp.lt.s32.totalorder %s3377_s21, 3 }
   0x4   : > { %p213_p2 = pnand %p2907_p0, %p212_p1 }
   0x5   : > { %p242_p3 = scmp.lt.s32.totalorder (!%p213_p2), %s2903_s22, 1  ;;  %s3379_s27 = smov (!%p213_p2), 8   ;;  %vm284_vm0 = vcmask (!%p213_p2), 31744   ;;  %v1895_v22 = vld [vmem:[%s4648_s1] sm:$0xff] (!%p213_p2)  ;;  %v1896_v23 = vld [vmem:[%s4648_s1 + $0x8] sm:$0xff] (!%p213_p2)  ;;  %v1897_v26 = vld [vmem:[%s4648_s1 + $0x10] sm:$0xff] (!%p213_p2) }
   0x6   : > { %216 = sbr.rel (%p213_p2) target bundleno = 2316 (0x90c), region = 44  ;;  %s3380_s28 = smov (!%p213_p2), 4   ;;  %v3295_v25 = vpack.c.bf16 (!%p213_p2), %v1896_v23, %v1895_v22  ;;  %v1898_v27 = vld [vmem:[%s4648_s1 + $0x18] sm:$0xff] (!%p213_p2)  ;;  %v1899_v31 = vld [vmem:[%s4648_s1 + $0x20] sm:$0xf] (!%p213_p2)  ;;  %vm1997_vm1 = vcmask (!%p213_p2), 1043456  }
   0x7   : > { %s3381_s29 = smov (!%p213_p2), 12   ;;  %s3382_s30 = smov (!%p213_p2), 16   ;;  %v3299_v28 = vpack.c.bf16 (!%p213_p2), %v1898_v27, %v1897_v26  ;;  %vm477_vm2 = vcmask (!%p213_p2), 64544   ;;  %vm670_vm3 = vcmask (!%p213_p2), 97344   ;;  %vm864_vm4 = vcmask (!%p213_p2), 130144  }
   0x8   : > { %s3383_s7 = smov (!%p213_p2), 20   ;;  %s3384_s8 = smov (!%p213_p2), 24   ;;  %3296 = vmatprep.subr.bf16.mxu0 (!%p213_p2), %v3295_v25  ;;  %vm1057_vm5 = vcmask (!%p213_p2), 162944   ;;  %vm1250_vm6 = vcmask (!%p213_p2), 195744   ;;  %vm1444_vm7 = vcmask (!%p213_p2), 228544   ;;  %vm1637_vm8 = vcmask (!%p213_p2), 261344  }
   0x9   : > { %s3385_s13 = smov (!%p213_p2), 28   ;;  %3298 = vmatpush3.bf16.msra.mxu0 (!%p213_p2), %v3295_v25  ;;  %s3386_s18 = smov (!%p213_p2), 32   ;;  %vm1830_vm9 = vcmask (!%p213_p2), 294144   ;;  %vm1900_vm10 = vcmask (!%p213_p2), 293888   ;;  %vm2258_vm11 = vcmask (!%p213_p2), 64512   ;;  %vm3389_vm12 = vmmov (!%p213_p2), 0  }
   0xa   : > { %3300 = vmatprep.subr.bf16.mxu0 (!%p213_p2), %v3299_v28  ;;  %s3391_s25 = smov (!%p213_p2), 124   ;;  %vm2482_vm13 = vcmask (!%p213_p2), 261120  }
   0xd   : > { %s4655_s22 = smov (!%p242_p3, %s2903_s22), 1  ;;  %3302 = vmatpush3.bf16.msra.mxu0 %v3299_v28 }
   0xe   : > { %s3341_s23 = smul.u32 432, %s4655_s22  ;;  %3229 = vmatprep.subr.msk.mxu0 %vm1997_vm1, %v1899_v31 }
  0x10   : > { %s3441_s26 = scalar_lea.vmem %s4647_s0, %s3341_s23 }
  0x11   : > { %v510_v0 = vld [vmem:[%s3441_s26 + $0x2] sm:$0xff]  ;;  %v511_v3 = vld [vmem:[%s3441_s26 + $0xa] sm:$0xff]  ;;  %v2911_v5 = vld [vmem:[%s3441_s26 + $0x18] sm:$0xff]  ;;  %3230 = vmatpush3.msk.msra.mxu0 %vm1997_vm1, %v1899_v31 }
  0x12   : > { %v317_v1 = vld [vmem:[%s3441_s26 + $0x1] sm:$0xff]  ;;  %574 = vrot.lane.b32.xlu1 %v510_v0, %s3379_s27  ;;  %v318_v4 = vld [vmem:[%s3441_s26 + $0x9] sm:$0xff]  ;;  %287 = vst.msk [vmem:[#allocation2 + $0x10] sm:$0xff] %vm284_vm0, %v2911_v5  ;;  %v3008_v7 = vld [vmem:[%s3441_s26 + $0x38] sm:$0xff] }
  0x13   : > { %381 = vrot.lane.b32.xlu0 %v317_v1, %s3380_s28  ;;  %v2912_v2 = vld [vmem:[%s3441_s26 + $0x20] sm:$0xff]  ;;  %v3007_v6 = vld [vmem:[%s3441_s26 + $0x30] sm:$0xff]  ;;  %290 = vst.msk [vmem:[#allocation2 + $0x28] sm:$0xff] %vm284_vm0, %v3008_v7  ;;  %v3460_v8 = vld [vmem:[%s3441_s26 + $0x48] sm:$0xff] }
  0x14   : > { %288 = vst.msk [vmem:[#allocation2 + $0x18] sm:$0xff] %vm284_vm0, %v2912_v2  ;;  %289 = vst.msk [vmem:[#allocation2 + $0x20] sm:$0xff] %vm284_vm0, %v3007_v6  ;;  %v3463_v9 = vld [vmem:[%s3441_s26 + $0x50] sm:$0xff]  ;;  %v3470_v10 = vld [vmem:[%s3441_s26 + $0x60] sm:$0xff] }
  0x15   : > { %291 = vst.msk [vmem:[#allocation2 + $0x30] sm:$0xff] %vm284_vm0, %v3460_v8  ;;  %292 = vst.msk [vmem:[#allocation2 + $0x38] sm:$0xff] %vm284_vm0, %v3463_v9  ;;  %v3473_v11 = vld [vmem:[%s3441_s26 + $0x68] sm:$0xff]  ;;  %v319_v12 = vld [vmem:[%s3441_s26 + $0x19] sm:$0xff] }
  0x16   : > { %576 = vrot.lane.b32.xlu1 %v511_v3, %s3379_s27  ;;  %293 = vst.msk [vmem:[#allocation2 + $0x40] sm:$0xff] %vm284_vm0, %v3470_v10  ;;  %294 = vst.msk [vmem:[#allocation2 + $0x48] sm:$0xff] %vm284_vm0, %v3473_v11  ;;  %v252_v13 = vld [vmem:[%s3441_s26] sm:$0xff]  ;;  %v253_v14 = vld [vmem:[%s3441_s26 + $0x8] sm:$0xff] }
  0x17   : > { %383 = vrot.lane.b32.xlu0 %v318_v4, %s3380_s28  ;;  %285 = vst.msk [vmem:[#allocation2] sm:$0xff] %vm284_vm0, %v252_v13  ;;  %286 = vst.msk [vmem:[#allocation2 + $0x8] sm:$0xff] %vm284_vm0, %v253_v14  ;;  %v3487_v15 = vld [vmem:[%s3441_s26 + $0x78] sm:$0xff]  ;;  %v3490_v16 = vld [vmem:[%s3441_s26 + $0x80] sm:$0xff] }
  0x18   : > { %295 = vst.msk [vmem:[#allocation2 + $0x50] sm:$0xff] %vm284_vm0, %v3487_v15  ;;  %296 = vst.msk [vmem:[#allocation2 + $0x58] sm:$0xff] %vm284_vm0, %v3490_v16  ;;  %v2975_v17 = vld [vmem:[%s3441_s26 + $0x1a] sm:$0xff]  ;;  %v2976_v19 = vld [vmem:[%s3441_s26 + $0x22] sm:$0xff] }
  0x19   : > { %v2944_v18 = vld [vmem:[%s3441_s26 + $0x21] sm:$0xff]  ;;  %v3506_v20 = vld [vmem:[%s3441_s26 + $0x90] sm:$0xff]  ;;  %v3522_v24 = vld [vmem:[%s3441_s26 + $0x98] sm:$0xff] }
  0x1a   : > { %770 = vrot.lane.b32.xlu1 %v2912_v2, %s3381_s29  ;;  %297 = vst.msk [vmem:[#allocation2 + $0x60] sm:$0xff] %vm284_vm0, %v3506_v20  ;;  %v3039_v21 = vld [vmem:[%s3441_s26 + $0x31] sm:$0xff]  ;;  %298 = vst.msk [vmem:[#allocation2 + $0x68] sm:$0xff] %vm284_vm0, %v3522_v24  ;;  %v3040_v30 = vld [vmem:[%s3441_s26 + $0x39] sm:$0xff] }
  0x1b   : > { %768 = vrot.lane.b32.xlu0 %v2911_v5, %s3381_s29  ;;  %v3071_v29 = vld [vmem:[%s3441_s26 + $0x32] sm:$0xff]  ;;  %v3072_v32 = vld [vmem:[%s3441_s26 + $0x3a] sm:$0xff]  ;;  %v3553_v33 = vld [vmem:[%s3441_s26 + $0xa8] sm:$0xff] }
  0x1c   : > { %299 = vst.msk [vmem:[#allocation2 + $0x70] sm:$0xff] %vm284_vm0, %v3553_v33  ;;  %v3041_v34 = vld [vmem:[%s3441_s26 + $0x49] sm:$0xff]  ;;  %v3042_v37 = vld [vmem:[%s3441_s26 + $0x51] sm:$0xff]  ;;  %v3587_v39 = vld [vmem:[%s3441_s26 + $0xc0] sm:$0xff] }
  0x1d   : > { %v3565_v35 = vld [vmem:[%s3441_s26 + $0xb0] sm:$0xff]  ;;  %301 = vst.msk [vmem:[#allocation2 + $0x80] sm:$0xff] %vm284_vm0, %v3587_v39  ;;  %v3043_v40 = vld [vmem:[%s3441_s26 + $0x61] sm:$0xff]  ;;  %v3624_v49 = vld [vmem:[%s3441_s26 + $0xd8] sm:$0xff] }
  0x1e   : > { %385 = vrot.lane.b32.xlu1 %v319_v12, %s3380_s28  ;;  %300 = vst.msk [vmem:[#allocation2 + $0x78] sm:$0xff] %vm284_vm0, %v3565_v35  ;;  %v3073_v36 = vld [vmem:[%s3441_s26 + $0x4a] sm:$0xff]  ;;  %v3074_v38 = vld [vmem:[%s3441_s26 + $0x52] sm:$0xff]  ;;  %v3075_v42 = vld [vmem:[%s3441_s26 + $0x62] sm:$0xff] }
  0x1f   : > { %961 = vrot.lane.b32.xlu0 %v319_v12, %s3382_s30  ;;  %v3599_v41 = vld [vmem:[%s3441_s26 + $0xc8] sm:$0xff]  ;;  %303 = vst.msk [vmem:[#allocation2 + $0x90] sm:$0xff] %vm284_vm0, %v3624_v49  ;;  %v3045_v52 = vld [vmem:[%s3441_s26 + $0x79] sm:$0xff] }
  0x20   : > { %302 = vst.msk [vmem:[#allocation2 + $0x88] sm:$0xff] %vm284_vm0, %v3599_v41  ;;  %v3044_v43 = vld [vmem:[%s3441_s26 + $0x69] sm:$0xff]  ;;  %v3641_v55 = vld [vmem:[%s3441_s26 + $0xe0] sm:$0xff]  ;;  %v3691_v13 = vld [vmem:[%s3441_s26 + $0xf8] sm:$0xff] }
  0x21   : > { %v3076_v44 = vld [vmem:[%s3441_s26 + $0x6a] sm:$0xff]  ;;  %304 = vst.msk [vmem:[#allocation2 + $0x98] sm:$0xff] %vm284_vm0, %v3641_v55  ;;  %v3077_v58 = vld [vmem:[%s3441_s26 + $0x7a] sm:$0xff]  ;;  %v3078_v0 = vld [vmem:[%s3441_s26 + $0x82] sm:$0xff] }
  0x22   : > { %1154 = vrot.lane.b32.xlu1 %v2975_v17, %s3383_s7  ;;  %v3046_v59 = vld [vmem:[%s3441_s26 + $0x81] sm:$0xff]  ;;  %306 = vst.msk [vmem:[#allocation2 + $0xa8] sm:$0xff] %vm284_vm0, %v3691_v13 }
  0x23   : > { %963 = vrot.lane.b32.xlu0 %v2944_v18, %s3382_s30  ;;  %v3727_v31 = vld [vmem:[%s3441_s26 + $0x108] sm:$0xff] }
  0x24   : > { %307 = vst.msk [vmem:[#allocation2 + $0xb0] sm:$0xff] %vm284_vm0, %v3727_v31 }
  0x26   : > { %578 = vrot.lane.b32.xlu1 %v2975_v17, %s3379_s27  ;;  %v3079_v17 = vld [vmem:[%s3441_s26 + $0x92] sm:$0xff] }
  0x27   : > { %387 = vrot.lane.b32.xlu0 %v2944_v18, %s3380_s28  ;;  %v3048_v18 = vld [vmem:[%s3441_s26 + $0x99] sm:$0xff] }
  0x2a   : > { %1348 = vrot.lane.b32.xlu1 %v3007_v6, %s3384_s8 }
  0x2b   : > { %1156 = vrot.lane.b32.xlu0 %v2976_v19, %s3383_s7 }
  0x2e   : > { %772 = vrot.lane.b32.xlu1 %v3007_v6, %s3381_s29 }
  0x2f   : > { %580 = vrot.lane.b32.xlu0 %v2976_v19, %s3379_s27 }
  0x32   : > { %1541 = vrot.lane.b32.xlu1 %v3039_v21, %s3385_s13 }
  0x33   : > { %1350 = vrot.lane.b32.xlu0 %v3008_v7, %s3384_s8 }
  0x36   : > { %965 = vrot.lane.b32.xlu1 %v3039_v21, %s3382_s30 }
  0x37   : > { %774 = vrot.lane.b32.xlu0 %v3008_v7, %s3381_s29  ;;  %v3675_v7 = vld [vmem:[%s3441_s26 + $0xf0] sm:$0xff] }
  0x38   : > { %305 = vst.msk [vmem:[#allocation2 + $0xa0] sm:$0xff] %vm284_vm0, %v3675_v7 }
  0x3a   : > { %1734 = vrot.lane.b32.xlu1 %v3071_v29, %s3386_s18 }
  0x3b   : > { %1543 = vrot.lane.b32.xlu0 %v3040_v30, %s3385_s13 }
  0x3e   : > { %967 = vrot.lane.b32.xlu1 %v3040_v30, %s3382_s30 }
  0x3f   : > { %389 = vrot.lane.b32.xlu0 %v3039_v21, %s3380_s28 }
  0x42   : > { %1736 = vrot.lane.b32.xlu1 %v3072_v32, %s3386_s18 }
  0x43   : > { %1158 = vrot.lane.b32.xlu0 %v3071_v29, %s3383_s7 }
  0x46   : > { %582 = vrot.lane.b32.xlu1 %v3071_v29, %s3379_s27 }
  0x47   : > { %391 = vrot.lane.b32.xlu0 %v3040_v30, %s3380_s28 }
  0x4a   : > { %1352 = vrot.lane.b32.xlu1 %v3460_v8, %s3384_s8 }
  0x4b   : > { %1160 = vrot.lane.b32.xlu0 %v3072_v32, %s3383_s7 }
  0x4e   : > { %776 = vrot.lane.b32.xlu1 %v3460_v8, %s3381_s29 }
  0x4f   : > { %584 = vrot.lane.b32.xlu0 %v3072_v32, %s3379_s27 }
  0x52   : > { %1545 = vrot.lane.b32.xlu1 %v3041_v34, %s3385_s13 }
  0x53   : > { %1354 = vrot.lane.b32.xlu0 %v3463_v9, %s3384_s8 }
  0x56   : > { %969 = vrot.lane.b32.xlu1 %v3041_v34, %s3382_s30 }
  0x57   : > { %778 = vrot.lane.b32.xlu0 %v3463_v9, %s3381_s29 }
  0x5a   : > { %1738 = vrot.lane.b32.xlu1 %v3073_v36, %s3386_s18 }
  0x5b   : > { %1547 = vrot.lane.b32.xlu0 %v3042_v37, %s3385_s13 }
  0x5e   : > { %971 = vrot.lane.b32.xlu1 %v3042_v37, %s3382_s30 }
  0x5f   : > { %393 = vrot.lane.b32.xlu0 %v3041_v34, %s3380_s28 }
  0x62   : > { %1740 = vrot.lane.b32.xlu1 %v3074_v38, %s3386_s18 }
  0x63   : > { %1162 = vrot.lane.b32.xlu0 %v3073_v36, %s3383_s7 }
  0x66   : > { %586 = vrot.lane.b32.xlu1 %v3073_v36, %s3379_s27  ;;  %v3049_v36 = vld [vmem:[%s3441_s26 + $0xa9] sm:$0xff] }
  0x67   : > { %395 = vrot.lane.b32.xlu0 %v3042_v37, %s3380_s28 }
  0x6a   : > { %1356 = vrot.lane.b32.xlu1 %v3470_v10, %s3384_s8 }
  0x6b   : > { %1164 = vrot.lane.b32.xlu0 %v3074_v38, %s3383_s7 }
  0x6e   : > { %780 = vrot.lane.b32.xlu1 %v3470_v10, %s3381_s29  ;;  %v3047_v10 = vld [vmem:[%s3441_s26 + $0x91] sm:$0xff] }
  0x6f   : > { %588 = vrot.lane.b32.xlu0 %v3074_v38, %s3379_s27 }
  0x72   : > { %1549 = vrot.lane.b32.xlu1 %v3043_v40, %s3385_s13 }
  0x73   : > { %1358 = vrot.lane.b32.xlu0 %v3473_v11, %s3384_s8 }
  0x76   : > { %973 = vrot.lane.b32.xlu1 %v3043_v40, %s3382_s30 }
  0x77   : > { %782 = vrot.lane.b32.xlu0 %v3473_v11, %s3381_s29 }
  0x7a   : > { %1742 = vrot.lane.b32.xlu1 %v3075_v42, %s3386_s18 }
  0x7b   : > { %1551 = vrot.lane.b32.xlu0 %v3044_v43, %s3385_s13 }
  0x7e   : > { %975 = vrot.lane.b32.xlu1 %v3044_v43, %s3382_s30 }
  0x7f   : > { %397 = vrot.lane.b32.xlu0 %v3043_v40, %s3380_s28  ;;  %v3743_v40 = vld [vmem:[%s3441_s26 + $0x110] sm:$0xff] }
  0x80   : > { %308 = vst.msk [vmem:[#allocation2 + $0xb8] sm:$0xff] %vm284_vm0, %v3743_v40 }
  0x82   : > { %1744 = vrot.lane.b32.xlu1 %v3076_v44, %s3386_s18 }
  0x83   : > { %1166 = vrot.lane.b32.xlu0 %v3075_v42, %s3383_s7 }
  0x84   : > { %v575_v45 = vpop.permute.xlu1 %574 }
  0x85   : > { %v382_v46 = vpop.permute.xlu0 %381 }
  0x86   : > { %478 = vst.msk [vmem:[#allocation2] sm:$0xff] %vm477_vm2, %v382_v46  ;;  %590 = vrot.lane.b32.xlu1 %v3075_v42, %s3379_s27 }
  0x87   : > { %399 = vrot.lane.b32.xlu0 %v3044_v43, %s3380_s28  ;;  %671 = vst.msk [vmem:[#allocation2] sm:$0xff] %vm670_vm3, %v575_v45  ;;  %v3050_v45 = vld [vmem:[%s3441_s26 + $0xb1] sm:$0xff] }
  0x88   : > { %v577_v47 = vpop.permute.xlu1 %576 }
  0x89   : > { %v384_v48 = vpop.permute.xlu0 %383 }
  0x8a   : > { %479 = vst.msk [vmem:[#allocation2 + $0x8] sm:$0xff] %vm477_vm2, %v384_v48  ;;  %1360 = vrot.lane.b32.xlu1 %v3487_v15, %s3384_s8 }
  0x8b   : > { %1168 = vrot.lane.b32.xlu0 %v3076_v44, %s3383_s7  ;;  %672 = vst.msk [vmem:[#allocation2 + $0x8] sm:$0xff] %vm670_vm3, %v577_v47 }
  0x8c   : > { %v771_v50 = vpop.permute.xlu1 %770 }
  0x8d   : > { %v769_v51 = vpop.permute.xlu0 %768  ;;  %866 = vst.msk [vmem:[#allocation2 + $0x8] sm:$0xff] %vm864_vm4, %v771_v50 }
  0x8e   : > { %865 = vst.msk [vmem:[#allocation2] sm:$0xff] %vm864_vm4, %v769_v51  ;;  %784 = vrot.lane.b32.xlu1 %v3487_v15, %s3381_s29 }
  0x8f   : > { %592 = vrot.lane.b32.xlu0 %v3076_v44, %s3379_s27  ;;  %v3081_v44 = vld [vmem:[%s3441_s26 + $0xaa] sm:$0xff] }
  0x90   : > { %v386_v53 = vpop.permute.xlu1 %385 }
  0x91   : > { %v962_v54 = vpop.permute.xlu0 %961  ;;  %480 = vst.msk [vmem:[#allocation2 + $0x10] sm:$0xff] %vm477_vm2, %v386_v53 }
  0x92   : > { %1058 = vst.msk [vmem:[#allocation2] sm:$0xff] %vm1057_vm5, %v962_v54  ;;  %1553 = vrot.lane.b32.xlu1 %v3045_v52, %s3385_s13 }
  0x93   : > { %1362 = vrot.lane.b32.xlu0 %v3490_v16, %s3384_s8 }
  0x94   : > { %v1155_v56 = vpop.permute.xlu1 %1154 }
  0x95   : > { %v964_v57 = vpop.permute.xlu0 %963  ;;  %1251 = vst.msk [vmem:[#allocation2] sm:$0xff] %vm1250_vm6, %v1155_v56 }
  0x96   : > { %1059 = vst.msk [vmem:[#allocation2 + $0x8] sm:$0xff] %vm1057_vm5, %v964_v57  ;;  %977 = vrot.lane.b32.xlu1 %v3045_v52, %s3382_s30 }
  0x97   : > { %786 = vrot.lane.b32.xlu0 %v3490_v16, %s3381_s29 }
  0x98   : > { %v579_v60 = vpop.permute.xlu1 %578 }
  0x99   : > { %v388_v61 = vpop.permute.xlu0 %387  ;;  %673 = vst.msk [vmem:[#allocation2 + $0x10] sm:$0xff] %vm670_vm3, %v579_v60 }
  0x9a   : > { %481 = vst.msk [vmem:[#allocation2 + $0x18] sm:$0xff] %vm477_vm2, %v388_v61  ;;  %1746 = vrot.lane.b32.xlu1 %v3077_v58, %s3386_s18 }
  0x9b   : > { %1555 = vrot.lane.b32.xlu0 %v3046_v59, %s3385_s13 }
  0x9c   : > { %v1349_v62 = vpop.permute.xlu1 %1348 }
  0x9d   : > { %v1157_v63 = vpop.permute.xlu0 %1156  ;;  %1445 = vst.msk [vmem:[#allocation2] sm:$0xff] %vm1444_vm7, %v1349_v62  ;;  %v3051_v62 = vld [vmem:[%s3441_s26 + $0xc1] sm:$0xff] }
  0x9e   : > { %1252 = vst.msk [vmem:[#allocation2 + $0x8] sm:$0xff] %vm1250_vm6, %v1157_v63  ;;  %979 = vrot.lane.b32.xlu1 %v3046_v59, %s3382_s30 }
  0x9f   : > { %401 = vrot.lane.b32.xlu0 %v3045_v52, %s3380_s28 }
  0xa0   : > { %v773_v1 = vpop.permute.xlu1 %772 }
  0xa1   : > { %v581_v2 = vpop.permute.xlu0 %580  ;;  %867 = vst.msk [vmem:[#allocation2 + $0x10] sm:$0xff] %vm864_vm4, %v773_v1  ;;  %v3795_v1 = vld [vmem:[%s3441_s26 + $0x128] sm:$0xff] }
  0xa2   : > { %674 = vst.msk [vmem:[#allocation2 + $0x18] sm:$0xff] %vm670_vm3, %v581_v2  ;;  %1748 = vrot.lane.b32.xlu1 %v3078_v0, %s3386_s18 }
  0xa3   : > { %1170 = vrot.lane.b32.xlu0 %v3077_v58, %s3383_s7  ;;  %310 = vst.msk [vmem:[#allocation2 + $0xc8] sm:$0xff] %vm284_vm0, %v3795_v1 }
  0xa4   : > { %v1542_v3 = vpop.permute.xlu1 %1541 }
  0xa5   : > { %v1351_v4 = vpop.permute.xlu0 %1350  ;;  %1638 = vst.msk [vmem:[#allocation2] sm:$0xff] %vm1637_vm8, %v1542_v3 }
  0xa6   : > { %1446 = vst.msk [vmem:[#allocation2 + $0x8] sm:$0xff] %vm1444_vm7, %v1351_v4  ;;  %594 = vrot.lane.b32.xlu1 %v3077_v58, %s3379_s27  ;;  %v3083_v4 = vld [vmem:[%s3441_s26 + $0xc2] sm:$0xff] }
  0xa7   : > { %403 = vrot.lane.b32.xlu0 %v3046_v59, %s3380_s28  ;;  %v3779_v59 = vld [vmem:[%s3441_s26 + $0x120] sm:$0xff] }
  0xa8   : > { %v966_v5 = vpop.permute.xlu1 %965  ;;  %309 = vst.msk [vmem:[#allocation2 + $0xc0] sm:$0xff] %vm284_vm0, %v3779_v59 }
  0xa9   : > { %v775_v6 = vpop.permute.xlu0 %774  ;;  %1060 = vst.msk [vmem:[#allocation2 + $0x10] sm:$0xff] %vm1057_vm5, %v966_v5  ;;  %v3052_v5 = vld [vmem:[%s3441_s26 + $0xc9] sm:$0xff] }
  0xaa   : > { %868 = vst.msk [vmem:[#allocation2 + $0x18] sm:$0xff] %vm864_vm4, %v775_v6  ;;  %1364 = vrot.lane.b32.xlu1 %v3506_v20, %s3384_s8 }
  0xab   : > { %1172 = vrot.lane.b32.xlu0 %v3078_v0, %s3383_s7 }
  0xac   : > { %v1735_v8 = vpop.permute.xlu1 %1734 }
  0xad   : > { %v1544_v9 = vpop.permute.xlu0 %1543  ;;  %1831 = vst.msk [vmem:[#allocation2] sm:$0xff] %vm1830_vm9, %v1735_v8 }
  0xae   : > { %1639 = vst.msk [vmem:[#allocation2 + $0x8] sm:$0xff] %vm1637_vm8, %v1544_v9  ;;  %788 = vrot.lane.b32.xlu1 %v3506_v20, %s3381_s29 }
  0xaf   : > { %596 = vrot.lane.b32.xlu0 %v3078_v0, %s3379_s27 }
  0xb0   : > { %v968_v11 = vpop.permute.xlu1 %967 }
  0xb1   : > { %v390_v12 = vpop.permute.xlu0 %389  ;;  %1061 = vst.msk [vmem:[#allocation2 + $0x18] sm:$0xff] %vm1057_vm5, %v968_v11 }
  0xb2   : > { %482 = vst.msk [vmem:[#allocation2 + $0x20] sm:$0xff] %vm477_vm2, %v390_v12  ;;  %1557 = vrot.lane.b32.xlu1 %v3047_v10, %s3385_s13 }
  0xb3   : > { %1366 = vrot.lane.b32.xlu0 %v3522_v24, %s3384_s8 }
  0xb4   : > { %v1737_v14 = vpop.permute.xlu1 %1736  ;;  %v1863_v16 = vld [vmem:[#allocation2] sm:$0xff] }
  0xb5   : > { %v1159_v15 = vpop.permute.xlu0 %1158  ;;  %1832 = vst.msk [vmem:[#allocation2 + $0x8] sm:$0xff] %vm1830_vm9, %v1737_v14  ;;  %3231 = vmatprep.mubr.msk.f32.mxu0 %vm1900_vm10, %v1863_v16 }
  0xb6   : > { %1253 = vst.msk [vmem:[#allocation2 + $0x10] sm:$0xff] %vm1250_vm6, %v1159_v15  ;;  %981 = vrot.lane.b32.xlu1 %v3047_v10, %s3382_s30 }
  0xb7   : > { %790 = vrot.lane.b32.xlu0 %v3522_v24, %s3381_s29  ;;  %v3080_v24 = vld [vmem:[%s3441_s26 + $0x9a] sm:$0xff] }
  0xb8   : > { %v583_v19 = vpop.permute.xlu1 %582 }
  0xb9   : > { %v392_v20 = vpop.permute.xlu0 %391  ;;  %675 = vst.msk [vmem:[#allocation2 + $0x20] sm:$0xff] %vm670_vm3, %v583_v19  ;;  %v3831_v19 = vld [vmem:[%s3441_s26 + $0x138] sm:$0xff] }
  0xba   : > { %483 = vst.msk [vmem:[#allocation2 + $0x28] sm:$0xff] %vm477_vm2, %v392_v20  ;;  %1750 = vrot.lane.b32.xlu1 %v3079_v17, %s3386_s18 }
  0xbb   : > { %1559 = vrot.lane.b32.xlu0 %v3048_v18, %s3385_s13  ;;  %311 = vst.msk [vmem:[#allocation2 + $0xd0] sm:$0xff] %vm284_vm0, %v3831_v19 }
  0xbc   : > { %v1353_v21 = vpop.permute.xlu1 %1352  ;;  %v1864_v23 = vld [vmem:[#allocation2 + $0x8] sm:$0xff] }
  0xbd   : > { %v1161_v22 = vpop.permute.xlu0 %1160  ;;  %1447 = vst.msk [vmem:[#allocation2 + $0x10] sm:$0xff] %vm1444_vm7, %v1353_v21  ;;  %3232 = vmatmul.mubr.msk.f32.vlgmr.msra.gmra.mrb[0].mxu0 %vm1900_vm10, %v1864_v23 }
  0xbe   : > { %1254 = vst.msk [vmem:[#allocation2 + $0x18] sm:$0xff] %vm1250_vm6, %v1161_v22  ;;  %983 = vrot.lane.b32.xlu1 %v3048_v18, %s3382_s30  ;;  %v3053_v22 = vld [vmem:[%s3441_s26 + $0xd9] sm:$0xff] }
  0xbf   : > { %405 = vrot.lane.b32.xlu0 %v3047_v10, %s3380_s28 }
  0xc0   : > { %v777_v25 = vpop.permute.xlu1 %776 }
  0xc1   : > { %v585_v26 = vpop.permute.xlu0 %584  ;;  %869 = vst.msk [vmem:[#allocation2 + $0x20] sm:$0xff] %vm864_vm4, %v777_v25  ;;  %v3850_v25 = vld [vmem:[%s3441_s26 + $0x140] sm:$0xff] }
  0xc2   : > { %676 = vst.msk [vmem:[#allocation2 + $0x28] sm:$0xff] %vm670_vm3, %v585_v26  ;;  %1752 = vrot.lane.b32.xlu1 %v3080_v24, %s3386_s18 }
  0xc3   : > { %1174 = vrot.lane.b32.xlu0 %v3079_v17, %s3383_s7  ;;  %312 = vst.msk [vmem:[#allocation2 + $0xd8] sm:$0xff] %vm284_vm0, %v3850_v25 }
  0xc4   : > { %v1546_v27 = vpop.permute.xlu1 %1545 }
  0xc5   : > { %v1355_v28 = vpop.permute.xlu0 %1354  ;;  %1640 = vst.msk [vmem:[#allocation2 + $0x10] sm:$0xff] %vm1637_vm8, %v1546_v27 }
  0xc6   : > { %1448 = vst.msk [vmem:[#allocation2 + $0x18] sm:$0xff] %vm1444_vm7, %v1355_v28  ;;  %598 = vrot.lane.b32.xlu1 %v3079_v17, %s3379_s27  ;;  %v3085_v28 = vld [vmem:[%s3441_s26 + $0xda] sm:$0xff] }
  0xc7   : > { %407 = vrot.lane.b32.xlu0 %v3048_v18, %s3380_s28 }
  0xc8   : > { %v970_v29 = vpop.permute.xlu1 %969 }
  0xc9   : > { %v779_v30 = vpop.permute.xlu0 %778  ;;  %1062 = vst.msk [vmem:[#allocation2 + $0x20] sm:$0xff] %vm1057_vm5, %v970_v29  ;;  %v3054_v29 = vld [vmem:[%s3441_s26 + $0xe1] sm:$0xff] }
  0xca   : > { %870 = vst.msk [vmem:[#allocation2 + $0x28] sm:$0xff] %vm864_vm4, %v779_v30  ;;  %1368 = vrot.lane.b32.xlu1 %v3553_v33, %s3384_s8 }
  0xcb   : > { %1176 = vrot.lane.b32.xlu0 %v3080_v24, %s3383_s7 }
  0xcc   : > { %v1739_v32 = vpop.permute.xlu1 %1738 }
  0xcd   : > { %v1548_v34 = vpop.permute.xlu0 %1547  ;;  %1833 = vst.msk [vmem:[#allocation2 + $0x10] sm:$0xff] %vm1830_vm9, %v1739_v32 }
  0xce   : > { %1641 = vst.msk [vmem:[#allocation2 + $0x18] sm:$0xff] %vm1637_vm8, %v1548_v34  ;;  %792 = vrot.lane.b32.xlu1 %v3553_v33, %s3381_s29 }
  0xcf   : > { %600 = vrot.lane.b32.xlu0 %v3080_v24, %s3379_s27 }
  0xd0   : > { %v972_v37 = vpop.permute.xlu1 %971 }
  0xd1   : > { %v394_v38 = vpop.permute.xlu0 %393  ;;  %1063 = vst.msk [vmem:[#allocation2 + $0x28] sm:$0xff] %vm1057_vm5, %v972_v37 }
  0xd2   : > { %484 = vst.msk [vmem:[#allocation2 + $0x30] sm:$0xff] %vm477_vm2, %v394_v38  ;;  %1561 = vrot.lane.b32.xlu1 %v3049_v36, %s3385_s13 }
  0xd3   : > { %1370 = vrot.lane.b32.xlu0 %v3565_v35, %s3384_s8 }
  0xd4   : > { %v1741_v33 = vpop.permute.xlu1 %1740  ;;  %v1865_v43 = vld [vmem:[#allocation2 + $0x10] sm:$0xff] }
  0xd5   : > { %v1163_v42 = vpop.permute.xlu0 %1162  ;;  %1834 = vst.msk [vmem:[#allocation2 + $0x18] sm:$0xff] %vm1830_vm9, %v1741_v33  ;;  %3234 = vmatprep.mubr.msk.f32.mxu0 %vm1900_vm10, %v1865_v43 }
  0xd6   : > { %1255 = vst.msk [vmem:[#allocation2 + $0x20] sm:$0xff] %vm1250_vm6, %v1163_v42  ;;  %985 = vrot.lane.b32.xlu1 %v3049_v36, %s3382_s30 }
  0xd7   : > { %794 = vrot.lane.b32.xlu0 %v3565_v35, %s3381_s29  ;;  %v3082_v35 = vld [vmem:[%s3441_s26 + $0xb2] sm:$0xff] }
  0xd8   : > { %v587_v46 = vpop.permute.xlu1 %586 }
  0xd9   : > { %v396_v47 = vpop.permute.xlu0 %395  ;;  %677 = vst.msk [vmem:[#allocation2 + $0x30] sm:$0xff] %vm670_vm3, %v587_v46  ;;  %v3883_v46 = vld [vmem:[%s3441_s26 + $0x150] sm:$0xff] }
  0xda   : > { %485 = vst.msk [vmem:[#allocation2 + $0x38] sm:$0xff] %vm477_vm2, %v396_v47  ;;  %1754 = vrot.lane.b32.xlu1 %v3081_v44, %s3386_s18 }
  0xdb   : > { %1563 = vrot.lane.b32.xlu0 %v3050_v45, %s3385_s13  ;;  %313 = vst.msk [vmem:[#allocation2 + $0xe0] sm:$0xff] %vm284_vm0, %v3883_v46 }
  0xdc   : > { %v1357_v48 = vpop.permute.xlu1 %1356  ;;  %v1866_v51 = vld [vmem:[#allocation2 + $0x18] sm:$0xff] }
  0xdd   : > { %v1165_v50 = vpop.permute.xlu0 %1164  ;;  %1449 = vst.msk [vmem:[#allocation2 + $0x20] sm:$0xff] %vm1444_vm7, %v1357_v48  ;;  %3235 = vmatmul.mubr.msk.f32.gmra.mrb[2].mxu0 %vm1900_vm10, %v1866_v51 }
  0xde   : > { %1256 = vst.msk [vmem:[#allocation2 + $0x28] sm:$0xff] %vm1250_vm6, %v1165_v50  ;;  %987 = vrot.lane.b32.xlu1 %v3050_v45, %s3382_s30  ;;  %v3055_v50 = vld [vmem:[%s3441_s26 + $0xf1] sm:$0xff] }
  0xdf   : > { %409 = vrot.lane.b32.xlu0 %v3049_v36, %s3380_s28 }
  0xe0   : > { %v781_v52 = vpop.permute.xlu1 %780 }
  0xe1   : > { %v589_v53 = vpop.permute.xlu0 %588  ;;  %871 = vst.msk [vmem:[#allocation2 + $0x30] sm:$0xff] %vm864_vm4, %v781_v52  ;;  %v3902_v52 = vld [vmem:[%s3441_s26 + $0x158] sm:$0xff] }
  0xe2   : > { %678 = vst.msk [vmem:[#allocation2 + $0x38] sm:$0xff] %vm670_vm3, %v589_v53  ;;  %1756 = vrot.lane.b32.xlu1 %v3082_v35, %s3386_s18 }
  0xe3   : > { %1178 = vrot.lane.b32.xlu0 %v3081_v44, %s3383_s7  ;;  %314 = vst.msk [vmem:[#allocation2 + $0xe8] sm:$0xff] %vm284_vm0, %v3902_v52 }
  0xe4   : > { %v1550_v54 = vpop.permute.xlu1 %1549 }
  0xe5   : > { %v1359_v56 = vpop.permute.xlu0 %1358  ;;  %1642 = vst.msk [vmem:[#allocation2 + $0x20] sm:$0xff] %vm1637_vm8, %v1550_v54 }
  0xe6   : > { %1450 = vst.msk [vmem:[#allocation2 + $0x28] sm:$0xff] %vm1444_vm7, %v1359_v56  ;;  %602 = vrot.lane.b32.xlu1 %v3081_v44, %s3379_s27  ;;  %v3087_v56 = vld [vmem:[%s3441_s26 + $0xf2] sm:$0xff] }
  0xe7   : > { %411 = vrot.lane.b32.xlu0 %v3050_v45, %s3380_s28 }
  0xe8   : > { %v974_v57 = vpop.permute.xlu1 %973 }
  0xe9   : > { %v783_v58 = vpop.permute.xlu0 %782  ;;  %1064 = vst.msk [vmem:[#allocation2 + $0x30] sm:$0xff] %vm1057_vm5, %v974_v57  ;;  %v3056_v57 = vld [vmem:[%s3441_s26 + $0xf9] sm:$0xff] }
  0xea   : > { %872 = vst.msk [vmem:[#allocation2 + $0x38] sm:$0xff] %vm864_vm4, %v783_v58  ;;  %1372 = vrot.lane.b32.xlu1 %v3587_v39, %s3384_s8 }
  0xeb   : > { %1180 = vrot.lane.b32.xlu0 %v3082_v35, %s3383_s7 }
  0xec   : > { %v1743_v60 = vpop.permute.xlu1 %1742 }
  0xed   : > { %v1552_v61 = vpop.permute.xlu0 %1551  ;;  %1835 = vst.msk [vmem:[#allocation2 + $0x20] sm:$0xff] %vm1830_vm9, %v1743_v60 }
  0xee   : > { %1643 = vst.msk [vmem:[#allocation2 + $0x28] sm:$0xff] %vm1637_vm8, %v1552_v61  ;;  %796 = vrot.lane.b32.xlu1 %v3587_v39, %s3381_s29 }
  0xef   : > { %604 = vrot.lane.b32.xlu0 %v3082_v35, %s3379_s27 }
  0xf0   : > { %v976_v63 = vpop.permute.xlu1 %975 }
  0xf1   : > { %v398_v0 = vpop.permute.xlu0 %397  ;;  %1065 = vst.msk [vmem:[#allocation2 + $0x38] sm:$0xff] %vm1057_vm5, %v976_v63 }
  0xf2   : > { %486 = vst.msk [vmem:[#allocation2 + $0x40] sm:$0xff] %vm477_vm2, %v398_v0  ;;  %1565 = vrot.lane.b32.xlu1 %v3051_v62, %s3385_s13 }
  0xf3   : > { %1374 = vrot.lane.b32.xlu0 %v3599_v41, %s3384_s8 }
  0xf4   : > { %v1745_v39 = vpop.permute.xlu1 %1744  ;;  %v1867_v3 = vld [vmem:[#allocation2 + $0x20] sm:$0xff] }
  0xf5   : > { %v1167_v2 = vpop.permute.xlu0 %1166  ;;  %1836 = vst.msk [vmem:[#allocation2 + $0x28] sm:$0xff] %vm1830_vm9, %v1745_v39  ;;  %3237 = vmatprep.mubr.msk.f32.mxu0 %vm1900_vm10, %v1867_v3 }
  0xf6   : > { %1257 = vst.msk [vmem:[#allocation2 + $0x30] sm:$0xff] %vm1250_vm6, %v1167_v2  ;;  %989 = vrot.lane.b32.xlu1 %v3051_v62, %s3382_s30 }
  0xf7   : > { %798 = vrot.lane.b32.xlu0 %v3599_v41, %s3381_s29  ;;  %v3084_v41 = vld [vmem:[%s3441_s26 + $0xca] sm:$0xff] }
  0xf8   : > { %v591_v6 = vpop.permute.xlu1 %590 }
  0xf9   : > { %v400_v8 = vpop.permute.xlu0 %399  ;;  %679 = vst.msk [vmem:[#allocation2 + $0x40] sm:$0xff] %vm670_vm3, %v591_v6  ;;  %v3935_v6 = vld [vmem:[%s3441_s26 + $0x168] sm:$0xff] }
  0xfa   : > { %487 = vst.msk [vmem:[#allocation2 + $0x48] sm:$0xff] %vm477_vm2, %v400_v8  ;;  %1758 = vrot.lane.b32.xlu1 %v3083_v4, %s3386_s18 }
  0xfb   : > { %1567 = vrot.lane.b32.xlu0 %v3052_v5, %s3385_s13  ;;  %315 = vst.msk [vmem:[#allocation2 + $0xf0] sm:$0xff] %vm284_vm0, %v3935_v6 }
  0xfc   : > { %v1361_v9 = vpop.permute.xlu1 %1360  ;;  %v1868_v11 = vld [vmem:[#allocation2 + $0x28] sm:$0xff] }
  0xfd   : > { %v1169_v10 = vpop.permute.xlu0 %1168  ;;  %1451 = vst.msk [vmem:[#allocation2 + $0x30] sm:$0xff] %vm1444_vm7, %v1361_v9  ;;  %3238 = vmatmul.mubr.msk.f32.gmra.mrb[4].mxu0 %vm1900_vm10, %v1868_v11 }
  0xfe   : > { %1258 = vst.msk [vmem:[#allocation2 + $0x38] sm:$0xff] %vm1250_vm6, %v1169_v10  ;;  %991 = vrot.lane.b32.xlu1 %v3052_v5, %s3382_s30  ;;  %v3057_v10 = vld [vmem:[%s3441_s26 + $0x109] sm:$0xff] }
  0xff   : > { %413 = vrot.lane.b32.xlu0 %v3051_v62, %s3380_s28 }
 0x100   : > { %v785_v12 = vpop.permute.xlu1 %784 }
 0x101   : > { %v593_v14 = vpop.permute.xlu0 %592  ;;  %873 = vst.msk [vmem:[#allocation2 + $0x40] sm:$0xff] %vm864_vm4, %v785_v12  ;;  %v3954_v12 = vld [vmem:[%s3441_s26 + $0x170] sm:$0xff] }
 0x102   : > { %680 = vst.msk [vmem:[#allocation2 + $0x48] sm:$0xff] %vm670_vm3, %v593_v14  ;;  %1760 = vrot.lane.b32.xlu1 %v3084_v41, %s3386_s18 }
 0x103   : > { %1182 = vrot.lane.b32.xlu0 %v3083_v4, %s3383_s7  ;;  %316 = vst.msk [vmem:[#allocation2 + $0xf8] sm:$0xff] %vm284_vm0, %v3954_v12 }
 0x104   : > { %v1554_v15 = vpop.permute.xlu1 %1553 }
 0x105   : > { %v1363_v16 = vpop.permute.xlu0 %1362  ;;  %1644 = vst.msk [vmem:[#allocation2 + $0x30] sm:$0xff] %vm1637_vm8, %v1554_v15 }
 0x106   : > { %1452 = vst.msk [vmem:[#allocation2 + $0x38] sm:$0xff] %vm1444_vm7, %v1363_v16  ;;  %606 = vrot.lane.b32.xlu1 %v3083_v4, %s3379_s27  ;;  %v3089_v16 = vld [vmem:[%s3441_s26 + $0x10a] sm:$0xff] }
 0x107   : > { %415 = vrot.lane.b32.xlu0 %v3052_v5, %s3380_s28 }
 0x108   : > { %v978_v17 = vpop.permute.xlu1 %977 }
 0x109   : > { %v787_v18 = vpop.permute.xlu0 %786  ;;  %1066 = vst.msk [vmem:[#allocation2 + $0x40] sm:$0xff] %vm1057_vm5, %v978_v17  ;;  %v3058_v17 = vld [vmem:[%s3441_s26 + $0x111] sm:$0xff] }
 0x10a   : > { %874 = vst.msk [vmem:[#allocation2 + $0x48] sm:$0xff] %vm864_vm4, %v787_v18  ;;  %1376 = vrot.lane.b32.xlu1 %v3624_v49, %s3384_s8 }
 0x10b   : > { %1184 = vrot.lane.b32.xlu0 %v3084_v41, %s3383_s7 }
 0x10c   : > { %v1747_v20 = vpop.permute.xlu1 %1746 }
 0x10d   : > { %v1556_v21 = vpop.permute.xlu0 %1555  ;;  %1837 = vst.msk [vmem:[#allocation2 + $0x30] sm:$0xff] %vm1830_vm9, %v1747_v20 }
 0x10e   : > { %1645 = vst.msk [vmem:[#allocation2 + $0x38] sm:$0xff] %vm1637_vm8, %v1556_v21  ;;  %800 = vrot.lane.b32.xlu1 %v3624_v49, %s3381_s29 }
 0x10f   : > { %608 = vrot.lane.b32.xlu0 %v3084_v41, %s3379_s27 }
 0x110   : > { %v980_v23 = vpop.permute.xlu1 %979 }
 0x111   : > { %v402_v24 = vpop.permute.xlu0 %401  ;;  %1067 = vst.msk [vmem:[#allocation2 + $0x48] sm:$0xff] %vm1057_vm5, %v980_v23 }
 0x112   : > { %488 = vst.msk [vmem:[#allocation2 + $0x50] sm:$0xff] %vm477_vm2, %v402_v24  ;;  %1569 = vrot.lane.b32.xlu1 %v3053_v22, %s3385_s13 }
 0x113   : > { %1378 = vrot.lane.b32.xlu0 %v3641_v55, %s3384_s8 }
 0x114   : > { %v1749_v49 = vpop.permute.xlu1 %1748  ;;  %v1869_v27 = vld [vmem:[#allocation2 + $0x30] sm:$0xff] }
 0x115   : > { %v1171_v26 = vpop.permute.xlu0 %1170  ;;  %1838 = vst.msk [vmem:[#allocation2 + $0x38] sm:$0xff] %vm1830_vm9, %v1749_v49  ;;  %3240 = vmatprep.mubr.msk.f32.mxu0 %vm1900_vm10, %v1869_v27 }
 0x116   : > { %1259 = vst.msk [vmem:[#allocation2 + $0x40] sm:$0xff] %vm1250_vm6, %v1171_v26  ;;  %993 = vrot.lane.b32.xlu1 %v3053_v22, %s3382_s30 }
 0x117   : > { %802 = vrot.lane.b32.xlu0 %v3641_v55, %s3381_s29  ;;  %v3086_v55 = vld [vmem:[%s3441_s26 + $0xe2] sm:$0xff] }
 0x118   : > { %v595_v30 = vpop.permute.xlu1 %594 }
 0x119   : > { %v404_v32 = vpop.permute.xlu0 %403  ;;  %681 = vst.msk [vmem:[#allocation2 + $0x50] sm:$0xff] %vm670_vm3, %v595_v30 }
 0x11a   : > { %489 = vst.msk [vmem:[#allocation2 + $0x58] sm:$0xff] %vm477_vm2, %v404_v32  ;;  %1762 = vrot.lane.b32.xlu1 %v3085_v28, %s3386_s18 }
 0x11b   : > { %1571 = vrot.lane.b32.xlu0 %v3054_v29, %s3385_s13 }
 0x11c   : > { %v1365_v34 = vpop.permute.xlu1 %1364  ;;  %v1870_v37 = vld [vmem:[#allocation2 + $0x38] sm:$0xff] }
 0x11d   : > { %v1173_v36 = vpop.permute.xlu0 %1172  ;;  %1453 = vst.msk [vmem:[#allocation2 + $0x40] sm:$0xff] %vm1444_vm7, %v1365_v34  ;;  %3241 = vmatmul.mubr.msk.f32.gmra.mrb[6].mxu0 %vm1900_vm10, %v1870_v37  ;;  %v3059_v34 = vld [vmem:[%s3441_s26 + $0x121] sm:$0xff] }
 0x11e   : > { %1260 = vst.msk [vmem:[#allocation2 + $0x48] sm:$0xff] %vm1250_vm6, %v1173_v36  ;;  %995 = vrot.lane.b32.xlu1 %v3054_v29, %s3382_s30 }
 0x11f   : > { %417 = vrot.lane.b32.xlu0 %v3053_v22, %s3380_s28 }
 0x120   : > { %v789_v38 = vpop.permute.xlu1 %788 }
 0x121   : > { %v597_v33 = vpop.permute.xlu0 %596  ;;  %875 = vst.msk [vmem:[#allocation2 + $0x50] sm:$0xff] %vm864_vm4, %v789_v38 }
 0x122   : > { %682 = vst.msk [vmem:[#allocation2 + $0x58] sm:$0xff] %vm670_vm3, %v597_v33  ;;  %1764 = vrot.lane.b32.xlu1 %v3086_v55, %s3386_s18 }
 0x123   : > { %1186 = vrot.lane.b32.xlu0 %v3085_v28, %s3383_s7 }
 0x124   : > { %v1558_v42 = vpop.permute.xlu1 %1557 }
 0x125   : > { %v1367_v43 = vpop.permute.xlu0 %1366  ;;  %1646 = vst.msk [vmem:[#allocation2 + $0x40] sm:$0xff] %vm1637_vm8, %v1558_v42  ;;  %v3060_v42 = vld [vmem:[%s3441_s26 + $0x129] sm:$0xff] }
 0x126   : > { %1454 = vst.msk [vmem:[#allocation2 + $0x48] sm:$0xff] %vm1444_vm7, %v1367_v43  ;;  %610 = vrot.lane.b32.xlu1 %v3085_v28, %s3379_s27 }
 0x127   : > { %419 = vrot.lane.b32.xlu0 %v3054_v29, %s3380_s28 }
 0x128   : > { %v982_v44 = vpop.permute.xlu1 %981 }
 0x129   : > { %v791_v45 = vpop.permute.xlu0 %790  ;;  %1068 = vst.msk [vmem:[#allocation2 + $0x50] sm:$0xff] %vm1057_vm5, %v982_v44 }
 0x12a   : > { %876 = vst.msk [vmem:[#allocation2 + $0x58] sm:$0xff] %vm864_vm4, %v791_v45  ;;  %1380 = vrot.lane.b32.xlu1 %v3675_v7, %s3384_s8 }
 0x12b   : > { %1188 = vrot.lane.b32.xlu0 %v3086_v55, %s3383_s7 }
 0x12c   : > { %v1751_v47 = vpop.permute.xlu1 %1750 }
 0x12d   : > { %v1560_v48 = vpop.permute.xlu0 %1559  ;;  %1839 = vst.msk [vmem:[#allocation2 + $0x40] sm:$0xff] %vm1830_vm9, %v1751_v47 }
 0x12e   : > { %1647 = vst.msk [vmem:[#allocation2 + $0x48] sm:$0xff] %vm1637_vm8, %v1560_v48  ;;  %804 = vrot.lane.b32.xlu1 %v3675_v7, %s3381_s29 }
 0x12f   : > { %612 = vrot.lane.b32.xlu0 %v3086_v55, %s3379_s27 }
 0x130   : > { %v984_v51 = vpop.permute.xlu1 %983 }
 0x131   : > { %v406_v35 = vpop.permute.xlu0 %405  ;;  %1069 = vst.msk [vmem:[#allocation2 + $0x58] sm:$0xff] %vm1057_vm5, %v984_v51 }
 0x132   : > { %490 = vst.msk [vmem:[#allocation2 + $0x60] sm:$0xff] %vm477_vm2, %v406_v35  ;;  %1573 = vrot.lane.b32.xlu1 %v3055_v50, %s3385_s13 }
 0x133   : > { %1382 = vrot.lane.b32.xlu0 %v3691_v13, %s3384_s8 }
 0x134   : > { %v1753_v7 = vpop.permute.xlu1 %1752  ;;  %v1871_v54 = vld [vmem:[#allocation2 + $0x40] sm:$0xff] }
 0x135   : > { %v1175_v53 = vpop.permute.xlu0 %1174  ;;  %1840 = vst.msk [vmem:[#allocation2 + $0x48] sm:$0xff] %vm1830_vm9, %v1753_v7  ;;  %3243 = vmatprep.mubr.msk.f32.mxu0 %vm1900_vm10, %v1871_v54 }
 0x136   : > { %1261 = vst.msk [vmem:[#allocation2 + $0x50] sm:$0xff] %vm1250_vm6, %v1175_v53  ;;  %997 = vrot.lane.b32.xlu1 %v3055_v50, %s3382_s30 }
 0x137   : > { %806 = vrot.lane.b32.xlu0 %v3691_v13, %s3381_s29  ;;  %v3088_v13 = vld [vmem:[%s3441_s26 + $0xfa] sm:$0xff] }
 0x138   : > { %v599_v58 = vpop.permute.xlu1 %598 }
 0x139   : > { %v408_v60 = vpop.permute.xlu0 %407  ;;  %683 = vst.msk [vmem:[#allocation2 + $0x60] sm:$0xff] %vm670_vm3, %v599_v58  ;;  %v3061_v58 = vld [vmem:[%s3441_s26 + $0x139] sm:$0xff] }
 0x13a   : > { %491 = vst.msk [vmem:[#allocation2 + $0x68] sm:$0xff] %vm477_vm2, %v408_v60  ;;  %1766 = vrot.lane.b32.xlu1 %v3087_v56, %s3386_s18 }
 0x13b   : > { %1575 = vrot.lane.b32.xlu0 %v3056_v57, %s3385_s13 }
 0x13c   : > { %v1369_v61 = vpop.permute.xlu1 %1368  ;;  %v1872_v63 = vld [vmem:[#allocation2 + $0x48] sm:$0xff] }
 0x13d   : > { %v1177_v62 = vpop.permute.xlu0 %1176  ;;  %1455 = vst.msk [vmem:[#allocation2 + $0x50] sm:$0xff] %vm1444_vm7, %v1369_v61  ;;  %3244 = vmatmul.mubr.msk.f32.gmra.mrb[8].mxu0 %vm1900_vm10, %v1872_v63 }
 0x13e   : > { %1262 = vst.msk [vmem:[#allocation2 + $0x58] sm:$0xff] %vm1250_vm6, %v1177_v62  ;;  %999 = vrot.lane.b32.xlu1 %v3056_v57, %s3382_s30 }
 0x13f   : > { %421 = vrot.lane.b32.xlu0 %v3055_v50, %s3380_s28 }
 0x140   : > { %v793_v0 = vpop.permute.xlu1 %792 }
 0x141   : > { %v601_v39 = vpop.permute.xlu0 %600  ;;  %877 = vst.msk [vmem:[#allocation2 + $0x60] sm:$0xff] %vm864_vm4, %v793_v0 }
 0x142   : > { %684 = vst.msk [vmem:[#allocation2 + $0x68] sm:$0xff] %vm670_vm3, %v601_v39  ;;  %1768 = vrot.lane.b32.xlu1 %v3088_v13, %s3386_s18 }
 0x143   : > { %1190 = vrot.lane.b32.xlu0 %v3087_v56, %s3383_s7 }
 0x144   : > { %v1562_v2 = vpop.permute.xlu1 %1561 }
 0x145   : > { %v1371_v3 = vpop.permute.xlu0 %1370  ;;  %1648 = vst.msk [vmem:[#allocation2 + $0x50] sm:$0xff] %vm1637_vm8, %v1562_v2 }
 0x146   : > { %1456 = vst.msk [vmem:[#allocation2 + $0x58] sm:$0xff] %vm1444_vm7, %v1371_v3  ;;  %614 = vrot.lane.b32.xlu1 %v3087_v56, %s3379_s27  ;;  %v3093_v3 = vld [vmem:[%s3441_s26 + $0x13a] sm:$0xff] }
 0x147   : > { %423 = vrot.lane.b32.xlu0 %v3056_v57, %s3380_s28 }
 0x148   : > { %v986_v4 = vpop.permute.xlu1 %985 }
 0x149   : > { %v795_v5 = vpop.permute.xlu0 %794  ;;  %1070 = vst.msk [vmem:[#allocation2 + $0x60] sm:$0xff] %vm1057_vm5, %v986_v4  ;;  %v3062_v4 = vld [vmem:[%s3441_s26 + $0x141] sm:$0xff] }
 0x14a   : > { %878 = vst.msk [vmem:[#allocation2 + $0x68] sm:$0xff] %vm864_vm4, %v795_v5  ;;  %1384 = vrot.lane.b32.xlu1 %v3727_v31, %s3384_s8 }
 0x14b   : > { %1192 = vrot.lane.b32.xlu0 %v3088_v13, %s3383_s7 }
 0x14c   : > { %v1755_v8 = vpop.permute.xlu1 %1754 }
 0x14d   : > { %v1564_v9 = vpop.permute.xlu0 %1563  ;;  %1841 = vst.msk [vmem:[#allocation2 + $0x50] sm:$0xff] %vm1830_vm9, %v1755_v8 }
 0x14e   : > { %1649 = vst.msk [vmem:[#allocation2 + $0x58] sm:$0xff] %vm1637_vm8, %v1564_v9  ;;  %808 = vrot.lane.b32.xlu1 %v3727_v31, %s3381_s29 }
 0x14f   : > { %616 = vrot.lane.b32.xlu0 %v3088_v13, %s3379_s27 }
 0x150   : > { %v988_v11 = vpop.permute.xlu1 %987 }
 0x151   : > { %v410_v41 = vpop.permute.xlu0 %409  ;;  %1071 = vst.msk [vmem:[#allocation2 + $0x68] sm:$0xff] %vm1057_vm5, %v988_v11 }
 0x152   : > { %492 = vst.msk [vmem:[#allocation2 + $0x70] sm:$0xff] %vm477_vm2, %v410_v41  ;;  %1577 = vrot.lane.b32.xlu1 %v3057_v10, %s3385_s13 }
 0x153   : > { %1386 = vrot.lane.b32.xlu0 %v3743_v40, %s3384_s8 }
 0x154   : > { %v1757_v31 = vpop.permute.xlu1 %1756  ;;  %v1873_v15 = vld [vmem:[#allocation2 + $0x50] sm:$0xff] }
 0x155   : > { %v1179_v14 = vpop.permute.xlu0 %1178  ;;  %1842 = vst.msk [vmem:[#allocation2 + $0x58] sm:$0xff] %vm1830_vm9, %v1757_v31  ;;  %3246 = vmatprep.mubr.msk.f32.mxu0 %vm1900_vm10, %v1873_v15 }
 0x156   : > { %1263 = vst.msk [vmem:[#allocation2 + $0x60] sm:$0xff] %vm1250_vm6, %v1179_v14  ;;  %1001 = vrot.lane.b32.xlu1 %v3057_v10, %s3382_s30 }
 0x157   : > { %810 = vrot.lane.b32.xlu0 %v3743_v40, %s3381_s29  ;;  %v3090_v40 = vld [vmem:[%s3441_s26 + $0x112] sm:$0xff] }
 0x158   : > { %v603_v18 = vpop.permute.xlu1 %602 }
 0x159   : > { %v412_v20 = vpop.permute.xlu0 %411  ;;  %685 = vst.msk [vmem:[#allocation2 + $0x70] sm:$0xff] %vm670_vm3, %v603_v18 }
 0x15a   : > { %493 = vst.msk [vmem:[#allocation2 + $0x78] sm:$0xff] %vm477_vm2, %v412_v20  ;;  %1770 = vrot.lane.b32.xlu1 %v3089_v16, %s3386_s18 }
 0x15b   : > { %1579 = vrot.lane.b32.xlu0 %v3058_v17, %s3385_s13 }
 0x15c   : > { %v1373_v21 = vpop.permute.xlu1 %1372  ;;  %v1874_v23 = vld [vmem:[#allocation2 + $0x58] sm:$0xff] }
 0x15d   : > { %v1181_v22 = vpop.permute.xlu0 %1180  ;;  %1457 = vst.msk [vmem:[#allocation2 + $0x60] sm:$0xff] %vm1444_vm7, %v1373_v21  ;;  %3247 = vmatmul.mubr.msk.f32.gmra.mrb[10].mxu0 %vm1900_vm10, %v1874_v23  ;;  %v3063_v21 = vld [vmem:[%s3441_s26 + $0x151] sm:$0xff] }
 0x15e   : > { %1264 = vst.msk [vmem:[#allocation2 + $0x68] sm:$0xff] %vm1250_vm6, %v1181_v22  ;;  %1003 = vrot.lane.b32.xlu1 %v3058_v17, %s3382_s30 }
 0x15f   : > { %425 = vrot.lane.b32.xlu0 %v3057_v10, %s3380_s28 }
 0x160   : > { %v797_v24 = vpop.permute.xlu1 %796 }
 0x161   : > { %v605_v49 = vpop.permute.xlu0 %604  ;;  %879 = vst.msk [vmem:[#allocation2 + $0x70] sm:$0xff] %vm864_vm4, %v797_v24 }
 0x162   : > { %686 = vst.msk [vmem:[#allocation2 + $0x78] sm:$0xff] %vm670_vm3, %v605_v49  ;;  %1772 = vrot.lane.b32.xlu1 %v3090_v40, %s3386_s18 }
 0x163   : > { %1194 = vrot.lane.b32.xlu0 %v3089_v16, %s3383_s7 }
 0x164   : > { %v1566_v26 = vpop.permute.xlu1 %1565 }
 0x165   : > { %v1375_v27 = vpop.permute.xlu0 %1374  ;;  %1650 = vst.msk [vmem:[#allocation2 + $0x60] sm:$0xff] %vm1637_vm8, %v1566_v26 }
 0x166   : > { %1458 = vst.msk [vmem:[#allocation2 + $0x68] sm:$0xff] %vm1444_vm7, %v1375_v27  ;;  %618 = vrot.lane.b32.xlu1 %v3089_v16, %s3379_s27 }
 0x167   : > { %427 = vrot.lane.b32.xlu0 %v3058_v17, %s3380_s28 }
 0x168   : > { %v990_v28 = vpop.permute.xlu1 %989 }
 0x169   : > { %v799_v29 = vpop.permute.xlu0 %798  ;;  %1072 = vst.msk [vmem:[#allocation2 + $0x70] sm:$0xff] %vm1057_vm5, %v990_v28 }
 0x16a   : > { %880 = vst.msk [vmem:[#allocation2 + $0x78] sm:$0xff] %vm864_vm4, %v799_v29  ;;  %1388 = vrot.lane.b32.xlu1 %v3779_v59, %s3384_s8  ;;  %v3095_v29 = vld [vmem:[%s3441_s26 + $0x152] sm:$0xff] }
 0x16b   : > { %1196 = vrot.lane.b32.xlu0 %v3090_v40, %s3383_s7 }
 0x16c   : > { %v1759_v30 = vpop.permute.xlu1 %1758 }
 0x16d   : > { %v1568_v32 = vpop.permute.xlu0 %1567  ;;  %1843 = vst.msk [vmem:[#allocation2 + $0x60] sm:$0xff] %vm1830_vm9, %v1759_v30  ;;  %v3064_v30 = vld [vmem:[%s3441_s26 + $0x159] sm:$0xff] }
 0x16e   : > { %1651 = vst.msk [vmem:[#allocation2 + $0x68] sm:$0xff] %vm1637_vm8, %v1568_v32  ;;  %812 = vrot.lane.b32.xlu1 %v3779_v59, %s3381_s29  ;;  %v3091_v59 = vld [vmem:[%s3441_s26 + $0x122] sm:$0xff] }
 0x16f   : > { %620 = vrot.lane.b32.xlu0 %v3090_v40, %s3379_s27 }
 0x170   : > { %v992_v36 = vpop.permute.xlu1 %991 }
 0x171   : > { %v414_v37 = vpop.permute.xlu0 %413  ;;  %1073 = vst.msk [vmem:[#allocation2 + $0x78] sm:$0xff] %vm1057_vm5, %v992_v36 }
 0x172   : > { %494 = vst.msk [vmem:[#allocation2 + $0x80] sm:$0xff] %vm477_vm2, %v414_v37  ;;  %1581 = vrot.lane.b32.xlu1 %v3059_v34, %s3385_s13 }
 0x173   : > { %1390 = vrot.lane.b32.xlu0 %v3795_v1, %s3384_s8 }
 0x174   : > { %v1761_v55 = vpop.permute.xlu1 %1760  ;;  %v1875_v33 = vld [vmem:[#allocation2 + $0x60] sm:$0xff] }
 0x175   : > { %v1183_v38 = vpop.permute.xlu0 %1182  ;;  %1844 = vst.msk [vmem:[#allocation2 + $0x68] sm:$0xff] %vm1830_vm9, %v1761_v55  ;;  %3249 = vmatprep.mubr.msk.f32.mxu0 %vm1900_vm10, %v1875_v33 }
 0x176   : > { %1265 = vst.msk [vmem:[#allocation2 + $0x70] sm:$0xff] %vm1250_vm6, %v1183_v38  ;;  %1005 = vrot.lane.b32.xlu1 %v3059_v34, %s3382_s30 }
 0x177   : > { %814 = vrot.lane.b32.xlu0 %v3795_v1, %s3381_s29  ;;  %v3092_v1 = vld [vmem:[%s3441_s26 + $0x12a] sm:$0xff] }
 0x178   : > { %v607_v43 = vpop.permute.xlu1 %606 }
 0x179   : > { %v416_v44 = vpop.permute.xlu0 %415  ;;  %687 = vst.msk [vmem:[#allocation2 + $0x80] sm:$0xff] %vm670_vm3, %v607_v43 }
 0x17a   : > { %495 = vst.msk [vmem:[#allocation2 + $0x88] sm:$0xff] %vm477_vm2, %v416_v44  ;;  %1774 = vrot.lane.b32.xlu1 %v3091_v59, %s3386_s18 }
 0x17b   : > { %1583 = vrot.lane.b32.xlu0 %v3060_v42, %s3385_s13 }
 0x17c   : > { %v1377_v45 = vpop.permute.xlu1 %1376  ;;  %v1876_v48 = vld [vmem:[#allocation2 + $0x68] sm:$0xff] }
 0x17d   : > { %v1185_v47 = vpop.permute.xlu0 %1184  ;;  %1459 = vst.msk [vmem:[#allocation2 + $0x70] sm:$0xff] %vm1444_vm7, %v1377_v45  ;;  %3250 = vmatmul.mubr.msk.f32.gmra.mrb[12].mxu0 %vm1900_vm10, %v1876_v48  ;;  %v3065_v48 = vld [vmem:[%s3441_s26 + $0x169] sm:$0xff] }
 0x17e   : > { %1266 = vst.msk [vmem:[#allocation2 + $0x78] sm:$0xff] %vm1250_vm6, %v1185_v47  ;;  %1007 = vrot.lane.b32.xlu1 %v3060_v42, %s3382_s30 }
 0x17f   : > { %429 = vrot.lane.b32.xlu0 %v3059_v34, %s3380_s28 }
 0x180   : > { %v801_v50 = vpop.permute.xlu1 %800 }
 0x181   : > { %v609_v51 = vpop.permute.xlu0 %608  ;;  %881 = vst.msk [vmem:[#allocation2 + $0x80] sm:$0xff] %vm864_vm4, %v801_v50 }
 0x182   : > { %688 = vst.msk [vmem:[#allocation2 + $0x88] sm:$0xff] %vm670_vm3, %v609_v51  ;;  %1776 = vrot.lane.b32.xlu1 %v3092_v1, %s3386_s18 }
 0x183   : > { %1198 = vrot.lane.b32.xlu0 %v3091_v59, %s3383_s7 }
 0x184   : > { %v1570_v35 = vpop.permute.xlu1 %1569 }
 0x185   : > { %v1379_v7 = vpop.permute.xlu0 %1378  ;;  %1652 = vst.msk [vmem:[#allocation2 + $0x70] sm:$0xff] %vm1637_vm8, %v1570_v35 }
 0x186   : > { %1460 = vst.msk [vmem:[#allocation2 + $0x78] sm:$0xff] %vm1444_vm7, %v1379_v7  ;;  %622 = vrot.lane.b32.xlu1 %v3091_v59, %s3379_s27 }
 0x187   : > { %431 = vrot.lane.b32.xlu0 %v3060_v42, %s3380_s28 }
 0x188   : > { %v994_v53 = vpop.permute.xlu1 %993 }
 0x189   : > { %v803_v54 = vpop.permute.xlu0 %802  ;;  %1074 = vst.msk [vmem:[#allocation2 + $0x80] sm:$0xff] %vm1057_vm5, %v994_v53 }
 0x18a   : > { %882 = vst.msk [vmem:[#allocation2 + $0x88] sm:$0xff] %vm864_vm4, %v803_v54  ;;  %1392 = vrot.lane.b32.xlu1 %v3831_v19, %s3384_s8 }
 0x18b   : > { %1200 = vrot.lane.b32.xlu0 %v3092_v1, %s3383_s7 }
 0x18c   : > { %v1763_v56 = vpop.permute.xlu1 %1762 }
 0x18d   : > { %v1572_v57 = vpop.permute.xlu0 %1571  ;;  %1845 = vst.msk [vmem:[#allocation2 + $0x70] sm:$0xff] %vm1830_vm9, %v1763_v56 }
 0x18e   : > { %1653 = vst.msk [vmem:[#allocation2 + $0x78] sm:$0xff] %vm1637_vm8, %v1572_v57  ;;  %816 = vrot.lane.b32.xlu1 %v3831_v19, %s3381_s29  ;;  %v3097_v57 = vld [vmem:[%s3441_s26 + $0x16a] sm:$0xff] }
 0x18f   : > { %624 = vrot.lane.b32.xlu0 %v3092_v1, %s3379_s27 }
 0x190   : > { %v996_v60 = vpop.permute.xlu1 %995  ;;  %v3233_v62 = vpop.f32.mrb[0].mxu0 }
 0x191   : > { %v418_v61 = vpop.permute.xlu0 %417  ;;  %1075 = vst.msk [vmem:[#allocation2 + $0x88] sm:$0xff] %vm1057_vm5, %v996_v60  ;;  %v2227_v63 = vmax.f32 %v3233_v62, 0.0  ;;  %v2067_v13 = vpop.f32.mrb[1].mxu0 }
 0x192   : > { %496 = vst.msk [vmem:[#allocation2 + $0x90] sm:$0xff] %vm477_vm2, %v418_v61  ;;  %1585 = vrot.lane.b32.xlu1 %v3061_v58, %s3385_s13  ;;  %v2226_v19 = vmax.f32 %v2067_v13, 0.0 }
 0x193   : > { %1394 = vrot.lane.b32.xlu0 %v3850_v25, %s3384_s8  ;;  %2260 = vst.msk [vmem:[#allocation3 + $0x8] sm:$0xff] %vm2258_vm11, %v2227_v63 }
 0x194   : > { %v1765_v0 = vpop.permute.xlu1 %1764  ;;  %v1877_v2 = vld [vmem:[#allocation2 + $0x70] sm:$0xff]  ;;  %2259 = vst.msk [vmem:[#allocation3] sm:$0xff] %vm2258_vm11, %v2226_v19 }
 0x195   : > { %v1187_v39 = vpop.permute.xlu0 %1186  ;;  %1846 = vst.msk [vmem:[#allocation2 + $0x78] sm:$0xff] %vm1830_vm9, %v1765_v0  ;;  %3252 = vmatprep.mubr.msk.f32.mxu0 %vm1900_vm10, %v1877_v2 }
 0x196   : > { %1267 = vst.msk [vmem:[#allocation2 + $0x80] sm:$0xff] %vm1250_vm6, %v1187_v39  ;;  %1009 = vrot.lane.b32.xlu1 %v3061_v58, %s3382_s30 }
 0x197   : > { %818 = vrot.lane.b32.xlu0 %v3850_v25, %s3381_s29  ;;  %v3094_v25 = vld [vmem:[%s3441_s26 + $0x142] sm:$0xff] }
 0x198   : > { %v611_v5 = vpop.permute.xlu1 %610 }
 0x199   : > { %v420_v8 = vpop.permute.xlu0 %419  ;;  %689 = vst.msk [vmem:[#allocation2 + $0x90] sm:$0xff] %vm670_vm3, %v611_v5 }
 0x19a   : > { %497 = vst.msk [vmem:[#allocation2 + $0x98] sm:$0xff] %vm477_vm2, %v420_v8  ;;  %1778 = vrot.lane.b32.xlu1 %v3093_v3, %s3386_s18 }
 0x19b   : > { %1587 = vrot.lane.b32.xlu0 %v3062_v4, %s3385_s13 }
 0x19c   : > { %v1381_v9 = vpop.permute.xlu1 %1380  ;;  %v1878_v11 = vld [vmem:[#allocation2 + $0x78] sm:$0xff] }
 0x19d   : > { %v1189_v10 = vpop.permute.xlu0 %1188  ;;  %1461 = vst.msk [vmem:[#allocation2 + $0x80] sm:$0xff] %vm1444_vm7, %v1381_v9  ;;  %3253 = vmatmul.mubr.msk.f32.gmra.mrb[14].mxu0 %vm1900_vm10, %v1878_v11  ;;  %v3067_v11 = vld [vmem:[%s3441_s26 + $0x181] sm:$0xff] }
 0x19e   : > { %1268 = vst.msk [vmem:[#allocation2 + $0x88] sm:$0xff] %vm1250_vm6, %v1189_v10  ;;  %1011 = vrot.lane.b32.xlu1 %v3062_v4, %s3382_s30  ;;  %v3036_v10 = vld [vmem:[%s3441_s26 + $0x188] sm:$0xff] }
 0x19f   : > { %433 = vrot.lane.b32.xlu0 %v3061_v58, %s3380_s28  ;;  %v3066_v58 = vld [vmem:[%s3441_s26 + $0x171] sm:$0xff] }
 0x1a0   : > { %v805_v41 = vpop.permute.xlu1 %804 }
 0x1a1   : > { %v613_v31 = vpop.permute.xlu0 %612  ;;  %883 = vst.msk [vmem:[#allocation2 + $0x90] sm:$0xff] %vm864_vm4, %v805_v41 }
 0x1a2   : > { %690 = vst.msk [vmem:[#allocation2 + $0x98] sm:$0xff] %vm670_vm3, %v613_v31  ;;  %1780 = vrot.lane.b32.xlu1 %v3094_v25, %s3386_s18 }
 0x1a3   : > { %1202 = vrot.lane.b32.xlu0 %v3093_v3, %s3383_s7 }
 0x1a4   : > { %v1574_v14 = vpop.permute.xlu1 %1573 }
 0x1a5   : > { %v1383_v15 = vpop.permute.xlu0 %1382  ;;  %1654 = vst.msk [vmem:[#allocation2 + $0x80] sm:$0xff] %vm1637_vm8, %v1574_v14 }
 0x1a6   : > { %1462 = vst.msk [vmem:[#allocation2 + $0x88] sm:$0xff] %vm1444_vm7, %v1383_v15  ;;  %626 = vrot.lane.b32.xlu1 %v3093_v3, %s3379_s27  ;;  %v3035_v3 = vld [vmem:[%s3441_s26 + $0x180] sm:$0xff] }
 0x1a7   : > { %435 = vrot.lane.b32.xlu0 %v3062_v4, %s3380_s28 }
 0x1a8   : > { %v998_v16 = vpop.permute.xlu1 %997 }
 0x1a9   : > { %v807_v17 = vpop.permute.xlu0 %806  ;;  %1076 = vst.msk [vmem:[#allocation2 + $0x90] sm:$0xff] %vm1057_vm5, %v998_v16 }
 0x1aa   : > { %884 = vst.msk [vmem:[#allocation2 + $0x98] sm:$0xff] %vm864_vm4, %v807_v17  ;;  %1396 = vrot.lane.b32.xlu1 %v3883_v46, %s3384_s8 }
 0x1ab   : > { %1204 = vrot.lane.b32.xlu0 %v3094_v25, %s3383_s7 }
 0x1ac   : > { %v1767_v18 = vpop.permute.xlu1 %1766 }
 0x1ad   : > { %v1576_v20 = vpop.permute.xlu0 %1575  ;;  %1847 = vst.msk [vmem:[#allocation2 + $0x80] sm:$0xff] %vm1830_vm9, %v1767_v18 }
 0x1ae   : > { %1655 = vst.msk [vmem:[#allocation2 + $0x88] sm:$0xff] %vm1637_vm8, %v1576_v20  ;;  %820 = vrot.lane.b32.xlu1 %v3883_v46, %s3381_s29 }
 0x1af   : > { %628 = vrot.lane.b32.xlu0 %v3094_v25, %s3379_s27 }
 0x1b0   : > { %v1000_v22 = vpop.permute.xlu1 %999  ;;  %v3236_v40 = vpop.f32.mrb[2].mxu0 }
 0x1b1   : > { %v422_v23 = vpop.permute.xlu0 %421  ;;  %1077 = vst.msk [vmem:[#allocation2 + $0x98] sm:$0xff] %vm1057_vm5, %v1000_v22  ;;  %v2229_v24 = vmax.f32 %v3236_v40, 0.0  ;;  %v2077_v49 = vpop.f32.mrb[3].mxu0  ;;  %v3099_v22 = vld [vmem:[%s3441_s26 + $0x182] sm:$0xff] }
 0x1b2   : > { %498 = vst.msk [vmem:[#allocation2 + $0xa0] sm:$0xff] %vm477_vm2, %v422_v23  ;;  %1589 = vrot.lane.b32.xlu1 %v3063_v21, %s3385_s13  ;;  %v2228_v46 = vmax.f32 %v2077_v49, 0.0 }
 0x1b3   : > { %1398 = vrot.lane.b32.xlu0 %v3902_v52, %s3384_s8  ;;  %2262 = vst.msk [vmem:[#allocation3 + $0x18] sm:$0xff] %vm2258_vm11, %v2229_v24 }
 0x1b4   : > { %v1769_v26 = vpop.permute.xlu1 %1768  ;;  %v1879_v28 = vld [vmem:[#allocation2 + $0x80] sm:$0xff]  ;;  %2261 = vst.msk [vmem:[#allocation3 + $0x10] sm:$0xff] %vm2258_vm11, %v2228_v46 }
 0x1b5   : > { %v1191_v27 = vpop.permute.xlu0 %1190  ;;  %1848 = vst.msk [vmem:[#allocation2 + $0x88] sm:$0xff] %vm1830_vm9, %v1769_v26  ;;  %3255 = vmatprep.mubr.msk.f32.mxu0 %vm1900_vm10, %v1879_v28  ;;  %v3100_v26 = vld [vmem:[%s3441_s26 + $0x18a] sm:$0xff] }
 0x1b6   : > { %1269 = vst.msk [vmem:[#allocation2 + $0x90] sm:$0xff] %vm1250_vm6, %v1191_v27  ;;  %1013 = vrot.lane.b32.xlu1 %v3063_v21, %s3382_s30 }
 0x1b7   : > { %822 = vrot.lane.b32.xlu0 %v3902_v52, %s3381_s29  ;;  %v3096_v52 = vld [vmem:[%s3441_s26 + $0x15a] sm:$0xff] }
 0x1b8   : > { %v615_v32 = vpop.permute.xlu1 %614 }
 0x1b9   : > { %v424_v34 = vpop.permute.xlu0 %423  ;;  %691 = vst.msk [vmem:[#allocation2 + $0xa0] sm:$0xff] %vm670_vm3, %v615_v32 }
 0x1ba   : > { %499 = vst.msk [vmem:[#allocation2 + $0xa8] sm:$0xff] %vm477_vm2, %v424_v34  ;;  %1782 = vrot.lane.b32.xlu1 %v3095_v29, %s3386_s18 }
 0x1bb   : > { %1591 = vrot.lane.b32.xlu0 %v3064_v30, %s3385_s13 }
 0x1bc   : > { %v1385_v36 = vpop.permute.xlu1 %1384  ;;  %v1880_v55 = vld [vmem:[#allocation2 + $0x88] sm:$0xff] }
 0x1bd   : > { %v1193_v37 = vpop.permute.xlu0 %1192  ;;  %1463 = vst.msk [vmem:[#allocation2 + $0x90] sm:$0xff] %vm1444_vm7, %v1385_v36  ;;  %3256 = vmatmul.mubr.msk.f32.gmra.mrb[16].mxu0 %vm1900_vm10, %v1880_v55  ;;  %v3069_v36 = vld [vmem:[%s3441_s26 + $0x199] sm:$0xff] }
 0x1be   : > { %1270 = vst.msk [vmem:[#allocation2 + $0x98] sm:$0xff] %vm1250_vm6, %v1193_v37  ;;  %1015 = vrot.lane.b32.xlu1 %v3064_v30, %s3382_s30  ;;  %v3070_v37 = vld [vmem:[%s3441_s26 + $0x1a1] sm:$0xff] }
 0x1bf   : > { %437 = vrot.lane.b32.xlu0 %v3063_v21, %s3380_s28  ;;  %v3068_v21 = vld [vmem:[%s3441_s26 + $0x189] sm:$0xff] }
 0x1c0   : > { %v809_v38 = vpop.permute.xlu1 %808 }
 0x1c1   : > { %v617_v33 = vpop.permute.xlu0 %616  ;;  %885 = vst.msk [vmem:[#allocation2 + $0xa0] sm:$0xff] %vm864_vm4, %v809_v38  ;;  %v3101_v38 = vld [vmem:[%s3441_s26 + $0x19a] sm:$0xff] }
 0x1c2   : > { %692 = vst.msk [vmem:[#allocation2 + $0xa8] sm:$0xff] %vm670_vm3, %v617_v33  ;;  %1784 = vrot.lane.b32.xlu1 %v3096_v52, %s3386_s18  ;;  %v3102_v33 = vld [vmem:[%s3441_s26 + $0x1a2] sm:$0xff] }
 0x1c3   : > { %1206 = vrot.lane.b32.xlu0 %v3095_v29, %s3383_s7 }
 0x1c4   : > { %v1578_v59 = vpop.permute.xlu1 %1577 }
 0x1c5   : > { %v1387_v42 = vpop.permute.xlu0 %1386  ;;  %1656 = vst.msk [vmem:[#allocation2 + $0x90] sm:$0xff] %vm1637_vm8, %v1578_v59 }
 0x1c6   : > { %1464 = vst.msk [vmem:[#allocation2 + $0x98] sm:$0xff] %vm1444_vm7, %v1387_v42  ;;  %630 = vrot.lane.b32.xlu1 %v3095_v29, %s3379_s27  ;;  %v3037_v29 = vld [vmem:[%s3441_s26 + $0x198] sm:$0xff] }
 0x1c7   : > { %439 = vrot.lane.b32.xlu0 %v3064_v30, %s3380_s28  ;;  %v3038_v30 = vld [vmem:[%s3441_s26 + $0x1a0] sm:$0xff] }
 0x1c8   : > { %v1002_v43 = vpop.permute.xlu1 %1001 }
 0x1c9   : > { %v811_v44 = vpop.permute.xlu0 %810  ;;  %1078 = vst.msk [vmem:[#allocation2 + $0xa0] sm:$0xff] %vm1057_vm5, %v1002_v43 }
 0x1ca   : > { %886 = vst.msk [vmem:[#allocation2 + $0xa8] sm:$0xff] %vm864_vm4, %v811_v44  ;;  %1400 = vrot.lane.b32.xlu1 %v3935_v6, %s3384_s8 }
 0x1cb   : > { %1208 = vrot.lane.b32.xlu0 %v3096_v52, %s3383_s7 }
 0x1cc   : > { %v1771_v45 = vpop.permute.xlu1 %1770 }
 0x1cd   : > { %v1580_v47 = vpop.permute.xlu0 %1579  ;;  %1849 = vst.msk [vmem:[#allocation2 + $0x90] sm:$0xff] %vm1830_vm9, %v1771_v45 }
 0x1ce   : > { %1657 = vst.msk [vmem:[#allocation2 + $0x98] sm:$0xff] %vm1637_vm8, %v1580_v47  ;;  %824 = vrot.lane.b32.xlu1 %v3935_v6, %s3381_s29 }
 0x1cf   : > { %632 = vrot.lane.b32.xlu0 %v3096_v52, %s3379_s27 }
 0x1d0   : > { %v1004_v1 = vpop.permute.xlu1 %1003  ;;  %v3239_v51 = vpop.f32.mrb[4].mxu0 }
 0x1d1   : > { %v426_v50 = vpop.permute.xlu0 %425  ;;  %1079 = vst.msk [vmem:[#allocation2 + $0xa8] sm:$0xff] %vm1057_vm5, %v1004_v1  ;;  %v2231_v35 = vmax.f32 %v3239_v51, 0.0  ;;  %v2087_v7 = vpop.f32.mrb[5].mxu0 }
 0x1d2   : > { %500 = vst.msk [vmem:[#allocation2 + $0xb0] sm:$0xff] %vm477_vm2, %v426_v50  ;;  %1593 = vrot.lane.b32.xlu1 %v3065_v48, %s3385_s13  ;;  %v2230_v6 = vmax.f32 %v2087_v7, 0.0 }
 0x1d3   : > { %1402 = vrot.lane.b32.xlu0 %v3954_v12, %s3384_s8  ;;  %2264 = vst.msk [vmem:[#allocation3 + $0x28] sm:$0xff] %vm2258_vm11, %v2231_v35 }
 0x1d4   : > { %v1773_v53 = vpop.permute.xlu1 %1772  ;;  %v1881_v56 = vld [vmem:[#allocation2 + $0x90] sm:$0xff]  ;;  %2263 = vst.msk [vmem:[#allocation3 + $0x20] sm:$0xff] %vm2258_vm11, %v2230_v6 }
 0x1d5   : > { %v1195_v54 = vpop.permute.xlu0 %1194  ;;  %1850 = vst.msk [vmem:[#allocation2 + $0x98] sm:$0xff] %vm1830_vm9, %v1773_v53  ;;  %3258 = vmatprep.mubr.msk.f32.mxu0 %vm1900_vm10, %v1881_v56 }
 0x1d6   : > { %1271 = vst.msk [vmem:[#allocation2 + $0xa0] sm:$0xff] %vm1250_vm6, %v1195_v54  ;;  %1017 = vrot.lane.b32.xlu1 %v3065_v48, %s3382_s30 }
 0x1d7   : > { %826 = vrot.lane.b32.xlu0 %v3954_v12, %s3381_s29  ;;  %v3098_v12 = vld [vmem:[%s3441_s26 + $0x172] sm:$0xff] }
 0x1d8   : > { %v619_v60 = vpop.permute.xlu1 %618 }
 0x1d9   : > { %v428_v61 = vpop.permute.xlu0 %427  ;;  %693 = vst.msk [vmem:[#allocation2 + $0xb0] sm:$0xff] %vm670_vm3, %v619_v60 }
 0x1da   : > { %501 = vst.msk [vmem:[#allocation2 + $0xb8] sm:$0xff] %vm477_vm2, %v428_v61  ;;  %1786 = vrot.lane.b32.xlu1 %v3097_v57, %s3386_s18 }
 0x1db   : > { %1595 = vrot.lane.b32.xlu0 %v3066_v58, %s3385_s13 }
 0x1dc   : > { %v1389_v62 = vpop.permute.xlu1 %1388  ;;  %v1882_v13 = vld [vmem:[#allocation2 + $0x98] sm:$0xff] }
 0x1dd   : > { %v1197_v63 = vpop.permute.xlu0 %1196  ;;  %1465 = vst.msk [vmem:[#allocation2 + $0xa0] sm:$0xff] %vm1444_vm7, %v1389_v62  ;;  %3259 = vmatmul.mubr.msk.f32.gmra.mrb[18].mxu0 %vm1900_vm10, %v1882_v13 }
 0x1de   : > { %1272 = vst.msk [vmem:[#allocation2 + $0xa8] sm:$0xff] %vm1250_vm6, %v1197_v63  ;;  %1019 = vrot.lane.b32.xlu1 %v3066_v58, %s3382_s30 }
 0x1df   : > { %441 = vrot.lane.b32.xlu0 %v3065_v48, %s3380_s28 }
 0x1e0   : > { %v813_v19 = vpop.permute.xlu1 %812 }
 0x1e1   : > { %v621_v0 = vpop.permute.xlu0 %620  ;;  %887 = vst.msk [vmem:[#allocation2 + $0xb0] sm:$0xff] %vm864_vm4, %v813_v19 }
 0x1e2   : > { %694 = vst.msk [vmem:[#allocation2 + $0xb8] sm:$0xff] %vm670_vm3, %v621_v0  ;;  %1788 = vrot.lane.b32.xlu1 %v3098_v12, %s3386_s18 }
 0x1e3   : > { %1210 = vrot.lane.b32.xlu0 %v3097_v57, %s3383_s7 }
 0x1e4   : > { %v1582_v39 = vpop.permute.xlu1 %1581 }
 0x1e5   : > { %v1391_v2 = vpop.permute.xlu0 %1390  ;;  %1658 = vst.msk [vmem:[#allocation2 + $0xa0] sm:$0xff] %vm1637_vm8, %v1582_v39 }
 0x1e6   : > { %1466 = vst.msk [vmem:[#allocation2 + $0xa8] sm:$0xff] %vm1444_vm7, %v1391_v2  ;;  %634 = vrot.lane.b32.xlu1 %v3097_v57, %s3379_s27 }
 0x1e7   : > { %443 = vrot.lane.b32.xlu0 %v3066_v58, %s3380_s28 }
 0x1e8   : > { %v1006_v4 = vpop.permute.xlu1 %1005 }
 0x1e9   : > { %v815_v5 = vpop.permute.xlu0 %814  ;;  %1080 = vst.msk [vmem:[#allocation2 + $0xb0] sm:$0xff] %vm1057_vm5, %v1006_v4 }
 0x1ea   : > { %888 = vst.msk [vmem:[#allocation2 + $0xb8] sm:$0xff] %vm864_vm4, %v815_v5  ;;  %1404 = vrot.lane.b32.xlu1 %v3035_v3, %s3384_s8 }
 0x1eb   : > { %1212 = vrot.lane.b32.xlu0 %v3098_v12, %s3383_s7 }
 0x1ec   : > { %v1775_v8 = vpop.permute.xlu1 %1774 }
 0x1ed   : > { %v1584_v9 = vpop.permute.xlu0 %1583  ;;  %1851 = vst.msk [vmem:[#allocation2 + $0xa0] sm:$0xff] %vm1830_vm9, %v1775_v8 }
 0x1ee   : > { %1659 = vst.msk [vmem:[#allocation2 + $0xa8] sm:$0xff] %vm1637_vm8, %v1584_v9  ;;  %828 = vrot.lane.b32.xlu1 %v3035_v3, %s3381_s29 }
 0x1ef   : > { %636 = vrot.lane.b32.xlu0 %v3098_v12, %s3379_s27 }
 0x1f0   : > { %v1008_v25 = vpop.permute.xlu1 %1007  ;;  %v3242_v31 = vpop.f32.mrb[6].mxu0 }
 0x1f1   : > { %v430_v41 = vpop.permute.xlu0 %429  ;;  %1081 = vst.msk [vmem:[#allocation2 + $0xb8] sm:$0xff] %vm1057_vm5, %v1008_v25  ;;  %v2233_v14 = vmax.f32 %v3242_v31, 0.0  ;;  %v2097_v15 = vpop.f32.mrb[7].mxu0 }
 0x1f2   : > { %502 = vst.msk [vmem:[#allocation2 + $0xc0] sm:$0xff] %vm477_vm2, %v430_v41  ;;  %1597 = vrot.lane.b32.xlu1 %v3067_v11, %s3385_s13  ;;  %v2232_v16 = vmax.f32 %v2097_v15, 0.0 }
 0x1f3   : > { %1406 = vrot.lane.b32.xlu0 %v3036_v10, %s3384_s8  ;;  %2266 = vst.msk [vmem:[#allocation3 + $0x38] sm:$0xff] %vm2258_vm11, %v2233_v14 }
 0x1f4   : > { %v1777_v17 = vpop.permute.xlu1 %1776  ;;  %v1883_v20 = vld [vmem:[#allocation2 + $0xa0] sm:$0xff]  ;;  %2265 = vst.msk [vmem:[#allocation3 + $0x30] sm:$0xff] %vm2258_vm11, %v2232_v16 }
 0x1f5   : > { %v1199_v18 = vpop.permute.xlu0 %1198  ;;  %1852 = vst.msk [vmem:[#allocation2 + $0xa8] sm:$0xff] %vm1830_vm9, %v1777_v17  ;;  %3261 = vmatprep.mubr.msk.f32.mxu0 %vm1900_vm10, %v1883_v20 }
 0x1f6   : > { %1273 = vst.msk [vmem:[#allocation2 + $0xb0] sm:$0xff] %vm1250_vm6, %v1199_v18  ;;  %1021 = vrot.lane.b32.xlu1 %v3067_v11, %s3382_s30 }
 0x1f7   : > { %830 = vrot.lane.b32.xlu0 %v3036_v10, %s3381_s29 }
 0x1f8   : > { %v623_v23 = vpop.permute.xlu1 %622 }
 0x1f9   : > { %v432_v40 = vpop.permute.xlu0 %431  ;;  %695 = vst.msk [vmem:[#allocation2 + $0xc0] sm:$0xff] %vm670_vm3, %v623_v23 }
 0x1fa   : > { %503 = vst.msk [vmem:[#allocation2 + $0xc8] sm:$0xff] %vm477_vm2, %v432_v40  ;;  %1790 = vrot.lane.b32.xlu1 %v3099_v22, %s3386_s18 }
 0x1fb   : > { %1599 = vrot.lane.b32.xlu0 %v3068_v21, %s3385_s13 }
 0x1fc   : > { %v1393_v24 = vpop.permute.xlu1 %1392  ;;  %v1884_v46 = vld [vmem:[#allocation2 + $0xa8] sm:$0xff] }
 0x1fd   : > { %v1201_v49 = vpop.permute.xlu0 %1200  ;;  %1467 = vst.msk [vmem:[#allocation2 + $0xb0] sm:$0xff] %vm1444_vm7, %v1393_v24  ;;  %3262 = vmatmul.mubr.msk.f32.gmra.mrb[20].mxu0 %vm1900_vm10, %v1884_v46 }
 0x1fe   : > { %1274 = vst.msk [vmem:[#allocation2 + $0xb8] sm:$0xff] %vm1250_vm6, %v1201_v49  ;;  %1214 = vrot.lane.b32.xlu1 %v3099_v22, %s3383_s7 }
 0x1ff   : > { %1023 = vrot.lane.b32.xlu0 %v3068_v21, %s3382_s30 }
 0x200   : > { %v817_v27 = vpop.permute.xlu1 %816 }
 0x201   : > { %v625_v28 = vpop.permute.xlu0 %624  ;;  %889 = vst.msk [vmem:[#allocation2 + $0xc0] sm:$0xff] %vm864_vm4, %v817_v27 }
 0x202   : > { %696 = vst.msk [vmem:[#allocation2 + $0xc8] sm:$0xff] %vm670_vm3, %v625_v28  ;;  %1216 = vrot.lane.b32.xlu1 %v3100_v26, %s3383_s7 }
 0x203   : > { %1792 = vrot.lane.b32.xlu0 %v3100_v26, %s3386_s18 }
 0x204   : > { %v1586_v32 = vpop.permute.xlu1 %1585 }
 0x205   : > { %v1395_v34 = vpop.permute.xlu0 %1394  ;;  %1660 = vst.msk [vmem:[#allocation2 + $0xb0] sm:$0xff] %vm1637_vm8, %v1586_v32 }
 0x206   : > { %1468 = vst.msk [vmem:[#allocation2 + $0xb8] sm:$0xff] %vm1444_vm7, %v1395_v34  ;;  %1410 = vrot.lane.b32.xlu1 %v3038_v30, %s3384_s8 }
 0x207   : > { %1408 = vrot.lane.b32.xlu0 %v3037_v29, %s3384_s8 }
 0x208   : > { %v1010_v55 = vpop.permute.xlu1 %1009 }
 0x209   : > { %v819_v52 = vpop.permute.xlu0 %818  ;;  %1082 = vst.msk [vmem:[#allocation2 + $0xc0] sm:$0xff] %vm1057_vm5, %v1010_v55 }
 0x20a   : > { %890 = vst.msk [vmem:[#allocation2 + $0xc8] sm:$0xff] %vm864_vm4, %v819_v52  ;;  %1603 = vrot.lane.b32.xlu1 %v3070_v37, %s3385_s13 }
 0x20b   : > { %1601 = vrot.lane.b32.xlu0 %v3069_v36, %s3385_s13 }
 0x20c   : > { %v1779_v59 = vpop.permute.xlu1 %1778 }
 0x20d   : > { %v1588_v42 = vpop.permute.xlu0 %1587  ;;  %1853 = vst.msk [vmem:[#allocation2 + $0xb0] sm:$0xff] %vm1830_vm9, %v1779_v59 }
 0x20e   : > { %1661 = vst.msk [vmem:[#allocation2 + $0xb8] sm:$0xff] %vm1637_vm8, %v1588_v42  ;;  %1796 = vrot.lane.b32.xlu1 %v3102_v33, %s3386_s18 }
 0x20f   : > { %1794 = vrot.lane.b32.xlu0 %v3101_v38, %s3386_s18 }
 0x210   : > { %v1012_v43 = vpop.permute.xlu1 %1011  ;;  %v3245_v45 = vpop.f32.mrb[8].mxu0 }
 0x211   : > { %v434_v44 = vpop.permute.xlu0 %433  ;;  %1083 = vst.msk [vmem:[#allocation2 + $0xc8] sm:$0xff] %vm1057_vm5, %v1012_v43  ;;  %v2235_v47 = vmax.f32 %v3245_v45, 0.0  ;;  %v2107_v48 = vpop.f32.mrb[9].mxu0 }
 0x212   : > { %504 = vst.msk [vmem:[#allocation2 + $0xd0] sm:$0xff] %vm477_vm2, %v434_v44  ;;  %v2234_v1 = vmax.f32 %v2107_v48, 0.0 }
 0x213   : > { %2268 = vst.msk [vmem:[#allocation3 + $0x48] sm:$0xff] %vm2258_vm11, %v2235_v47 }
 0x214   : > { %v1781_v50 = vpop.permute.xlu1 %1780  ;;  %v1885_v35 = vld [vmem:[#allocation2 + $0xb0] sm:$0xff]  ;;  %2267 = vst.msk [vmem:[#allocation3 + $0x40] sm:$0xff] %vm2258_vm11, %v2234_v1 }
 0x215   : > { %v1203_v51 = vpop.permute.xlu0 %1202  ;;  %1854 = vst.msk [vmem:[#allocation2 + $0xb8] sm:$0xff] %vm1830_vm9, %v1781_v50  ;;  %3264 = vmatprep.mubr.msk.f32.mxu0 %vm1900_vm10, %v1885_v35 }
 0x216   : > { %1275 = vst.msk [vmem:[#allocation2 + $0xc0] sm:$0xff] %vm1250_vm6, %v1203_v51 }
 0x218   : > { %v627_v7 = vpop.permute.xlu1 %626 }
 0x219   : > { %v436_v6 = vpop.permute.xlu0 %435  ;;  %697 = vst.msk [vmem:[#allocation2 + $0xd0] sm:$0xff] %vm670_vm3, %v627_v7 }
 0x21a   : > { %505 = vst.msk [vmem:[#allocation2 + $0xd8] sm:$0xff] %vm477_vm2, %v436_v6 }
 0x21c   : > { %v1397_v53 = vpop.permute.xlu1 %1396  ;;  %v1886_v56 = vld [vmem:[#allocation2 + $0xb8] sm:$0xff] }
 0x21d   : > { %v1205_v54 = vpop.permute.xlu0 %1204  ;;  %1469 = vst.msk [vmem:[#allocation2 + $0xc0] sm:$0xff] %vm1444_vm7, %v1397_v53  ;;  %3265 = vmatmul.mubr.msk.f32.gmra.mrb[22].mxu0 %vm1900_vm10, %v1886_v56 }
 0x21e   : > { %1276 = vst.msk [vmem:[#allocation2 + $0xc8] sm:$0xff] %vm1250_vm6, %v1205_v54 }
 0x220   : > { %v821_v57 = vpop.permute.xlu1 %820 }
 0x221   : > { %v629_v58 = vpop.permute.xlu0 %628  ;;  %891 = vst.msk [vmem:[#allocation2 + $0xd0] sm:$0xff] %vm864_vm4, %v821_v57 }
 0x222   : > { %698 = vst.msk [vmem:[#allocation2 + $0xd8] sm:$0xff] %vm670_vm3, %v629_v58 }
 0x224   : > { %v1590_v60 = vpop.permute.xlu1 %1589 }
 0x225   : > { %v1399_v61 = vpop.permute.xlu0 %1398  ;;  %1662 = vst.msk [vmem:[#allocation2 + $0xc0] sm:$0xff] %vm1637_vm8, %v1590_v60 }
 0x226   : > { %1470 = vst.msk [vmem:[#allocation2 + $0xc8] sm:$0xff] %vm1444_vm7, %v1399_v61 }
 0x228   : > { %v1014_v62 = vpop.permute.xlu1 %1013 }
 0x229   : > { %v823_v63 = vpop.permute.xlu0 %822  ;;  %1084 = vst.msk [vmem:[#allocation2 + $0xd0] sm:$0xff] %vm1057_vm5, %v1014_v62 }
 0x22a   : > { %892 = vst.msk [vmem:[#allocation2 + $0xd8] sm:$0xff] %vm864_vm4, %v823_v63 }
 0x22c   : > { %v1783_v13 = vpop.permute.xlu1 %1782 }
 0x22d   : > { %v1592_v12 = vpop.permute.xlu0 %1591  ;;  %1855 = vst.msk [vmem:[#allocation2 + $0xc0] sm:$0xff] %vm1830_vm9, %v1783_v13 }
 0x22e   : > { %1663 = vst.msk [vmem:[#allocation2 + $0xc8] sm:$0xff] %vm1637_vm8, %v1592_v12 }
 0x230   : > { %v1016_v19 = vpop.permute.xlu1 %1015  ;;  %v3248_v39 = vpop.f32.mrb[10].mxu0 }
 0x231   : > { %v438_v0 = vpop.permute.xlu0 %437  ;;  %1085 = vst.msk [vmem:[#allocation2 + $0xd8] sm:$0xff] %vm1057_vm5, %v1016_v19  ;;  %v2237_v2 = vmax.f32 %v3248_v39, 0.0  ;;  %v2117_v3 = vpop.f32.mrb[11].mxu0 }
 0x232   : > { %506 = vst.msk [vmem:[#allocation2 + $0xe0] sm:$0xff] %vm477_vm2, %v438_v0  ;;  %v2236_v4 = vmax.f32 %v2117_v3, 0.0  ;;  %v4296_v3 = vld [vmem:[#allocation3 + $0x8] sm:$0xff] }
 0x233   : > { %2270 = vst.msk [vmem:[#allocation3 + $0x58] sm:$0xff] %vm2258_vm11, %v2237_v2  ;;  %v4294_v2 = vld [vmem:[#allocation3] sm:$0xff] }
 0x234   : > { %v1785_v5 = vpop.permute.xlu1 %1784  ;;  %v1887_v9 = vld [vmem:[#allocation2 + $0xc0] sm:$0xff]  ;;  %2269 = vst.msk [vmem:[#allocation3 + $0x50] sm:$0xff] %vm2258_vm11, %v2236_v4 }
 0x235   : > { %v1207_v8 = vpop.permute.xlu0 %1206  ;;  %1856 = vst.msk [vmem:[#allocation2 + $0xc8] sm:$0xff] %vm1830_vm9, %v1785_v5  ;;  %3267 = vmatprep.mubr.msk.f32.mxu0 %vm1900_vm10, %v1887_v9 }
 0x236   : > { %1277 = vst.msk [vmem:[#allocation2 + $0xd0] sm:$0xff] %vm1250_vm6, %v1207_v8  ;;  %v3305_v8 = vpack.c.bf16 %v4296_v3, %v4294_v2 }
 0x238   : > { %v631_v10 = vpop.permute.xlu1 %630 }
 0x239   : > { %v440_v11 = vpop.permute.xlu0 %439  ;;  %699 = vst.msk [vmem:[#allocation2 + $0xe0] sm:$0xff] %vm670_vm3, %v631_v10 }
 0x23a   : > { %507 = vst.msk [vmem:[#allocation2 + $0xe8] sm:$0xff] %vm477_vm2, %v440_v11 }
 0x23c   : > { %v1401_v25 = vpop.permute.xlu1 %1400  ;;  %v1888_v31 = vld [vmem:[#allocation2 + $0xc8] sm:$0xff] }
 0x23d   : > { %v1209_v41 = vpop.permute.xlu0 %1208  ;;  %1471 = vst.msk [vmem:[#allocation2 + $0xd0] sm:$0xff] %vm1444_vm7, %v1401_v25  ;;  %3268 = vmatmul.mubr.msk.f32.gmra.mrb[24].mxu0 %vm1900_vm10, %v1888_v31  ;;  %v4308_v31 = vld [vmem:[#allocation3 + $0x10] sm:$0xff] }
 0x23e   : > { %1278 = vst.msk [vmem:[#allocation2 + $0xd8] sm:$0xff] %vm1250_vm6, %v1209_v41 }
 0x240   : > { %v825_v14 = vpop.permute.xlu1 %824 }
 0x241   : > { %v633_v15 = vpop.permute.xlu0 %632  ;;  %893 = vst.msk [vmem:[#allocation2 + $0xe0] sm:$0xff] %vm864_vm4, %v825_v14  ;;  %v4310_v14 = vld [vmem:[#allocation3 + $0x18] sm:$0xff] }
 0x242   : > { %700 = vst.msk [vmem:[#allocation2 + $0xe8] sm:$0xff] %vm670_vm3, %v633_v15 }
 0x244   : > { %v1594_v16 = vpop.permute.xlu1 %1593 }
 0x245   : > { %v1403_v17 = vpop.permute.xlu0 %1402  ;;  %1664 = vst.msk [vmem:[#allocation2 + $0xd0] sm:$0xff] %vm1637_vm8, %v1594_v16 }
 0x246   : > { %1472 = vst.msk [vmem:[#allocation2 + $0xd8] sm:$0xff] %vm1444_vm7, %v1403_v17  ;;  %v3309_v17 = vpack.c.bf16 %v4310_v14, %v4308_v31 }
 0x248   : > { %v1018_v18 = vpop.permute.xlu1 %1017 }
 0x249   : > { %v827_v20 = vpop.permute.xlu0 %826  ;;  %1086 = vst.msk [vmem:[#allocation2 + $0xe0] sm:$0xff] %vm1057_vm5, %v1018_v18 }
 0x24a   : > { %894 = vst.msk [vmem:[#allocation2 + $0xe8] sm:$0xff] %vm864_vm4, %v827_v20 }
 0x24c   : > { %v1787_v21 = vpop.permute.xlu1 %1786 }
 0x24d   : > { %v1596_v22 = vpop.permute.xlu0 %1595  ;;  %1857 = vst.msk [vmem:[#allocation2 + $0xd0] sm:$0xff] %vm1830_vm9, %v1787_v21 }
 0x24e   : > { %1665 = vst.msk [vmem:[#allocation2 + $0xd8] sm:$0xff] %vm1637_vm8, %v1596_v22 }
 0x250   : > { %v1020_v23 = vpop.permute.xlu1 %1019  ;;  %v3251_v24 = vpop.f32.mrb[12].mxu0 }
 0x251   : > { %v442_v40 = vpop.permute.xlu0 %441  ;;  %1087 = vst.msk [vmem:[#allocation2 + $0xe8] sm:$0xff] %vm1057_vm5, %v1020_v23  ;;  %v2239_v49 = vmax.f32 %v3251_v24, 0.0  ;;  %v2127_v46 = vpop.f32.mrb[13].mxu0  ;;  %v4324_v24 = vld [vmem:[#allocation3 + $0x28] sm:$0xff] }
 0x252   : > { %508 = vst.msk [vmem:[#allocation2 + $0xf0] sm:$0xff] %vm477_vm2, %v442_v40  ;;  %v2238_v26 = vmax.f32 %v2127_v46, 0.0  ;;  %v4322_v40 = vld [vmem:[#allocation3 + $0x20] sm:$0xff] }
 0x253   : > { %2272 = vst.msk [vmem:[#allocation3 + $0x68] sm:$0xff] %vm2258_vm11, %v2239_v49 }
 0x254   : > { %v1789_v27 = vpop.permute.xlu1 %1788  ;;  %v1889_v29 = vld [vmem:[#allocation2 + $0xd0] sm:$0xff]  ;;  %2271 = vst.msk [vmem:[#allocation3 + $0x60] sm:$0xff] %vm2258_vm11, %v2238_v26  ;;  %v3313_v26 = vpack.c.bf16 %v4324_v24, %v4322_v40 }
 0x255   : > { %v1211_v28 = vpop.permute.xlu0 %1210  ;;  %1858 = vst.msk [vmem:[#allocation2 + $0xd8] sm:$0xff] %vm1830_vm9, %v1789_v27  ;;  %3270 = vmatprep.mubr.msk.f32.mxu0 %vm1900_vm10, %v1889_v29  ;;  %v3387_v27 = vmov 0.00390625  }
 0x256   : > { %1279 = vst.msk [vmem:[#allocation2 + $0xe0] sm:$0xff] %vm1250_vm6, %v1211_v28  ;;  %2387 = vmatprep.mubr.f32.mxu1 %v3387_v27 }
 0x258   : > { %v635_v32 = vpop.permute.xlu1 %634 }
 0x259   : > { %v444_v30 = vpop.permute.xlu0 %443  ;;  %701 = vst.msk [vmem:[#allocation2 + $0xf0] sm:$0xff] %vm670_vm3, %v635_v32 }
 0x25a   : > { %509 = vst.msk [vmem:[#allocation2 + $0xf8] sm:$0xff] %vm477_vm2, %v444_v30 }
 0x25c   : > { %v1405_v36 = vpop.permute.xlu1 %1404  ;;  %v1890_v37 = vld [vmem:[#allocation2 + $0xd8] sm:$0xff] }
 0x25d   : > { %v1213_v34 = vpop.permute.xlu0 %1212  ;;  %1473 = vst.msk [vmem:[#allocation2 + $0xe0] sm:$0xff] %vm1444_vm7, %v1405_v36  ;;  %3271 = vmatmul.mubr.msk.f32.gmra.mrb[26].mxu0 %vm1900_vm10, %v1890_v37  ;;  %v4337_v36 = vld [vmem:[#allocation3 + $0x30] sm:$0xff]  ;;  %v4339_v37 = vld [vmem:[#allocation3 + $0x38] sm:$0xff] }
 0x25e   : > { %1280 = vst.msk [vmem:[#allocation2 + $0xe8] sm:$0xff] %vm1250_vm6, %v1213_v34 }
 0x260   : > { %v829_v52 = vpop.permute.xlu1 %828 }
 0x261   : > { %v637_v55 = vpop.permute.xlu0 %636  ;;  %895 = vst.msk [vmem:[#allocation2 + $0xf0] sm:$0xff] %vm864_vm4, %v829_v52 }
 0x262   : > { %702 = vst.msk [vmem:[#allocation2 + $0xf8] sm:$0xff] %vm670_vm3, %v637_v55 }
 0x264   : > { %v1598_v33 = vpop.permute.xlu1 %1597 }
 0x265   : > { %v1407_v38 = vpop.permute.xlu0 %1406  ;;  %1666 = vst.msk [vmem:[#allocation2 + $0xe0] sm:$0xff] %vm1637_vm8, %v1598_v33 }
 0x266   : > { %1474 = vst.msk [vmem:[#allocation2 + $0xe8] sm:$0xff] %vm1444_vm7, %v1407_v38  ;;  %v3317_v38 = vpack.c.bf16 %v4339_v37, %v4337_v36 }
 0x268   : > { %v1022_v42 = vpop.permute.xlu1 %1021 }
 0x269   : > { %v831_v59 = vpop.permute.xlu0 %830  ;;  %1088 = vst.msk [vmem:[#allocation2 + $0xf0] sm:$0xff] %vm1057_vm5, %v1022_v42 }
 0x26a   : > { %896 = vst.msk [vmem:[#allocation2 + $0xf8] sm:$0xff] %vm864_vm4, %v831_v59 }
 0x26c   : > { %v1791_v44 = vpop.permute.xlu1 %1790 }
 0x26d   : > { %v1600_v43 = vpop.permute.xlu0 %1599  ;;  %1859 = vst.msk [vmem:[#allocation2 + $0xe0] sm:$0xff] %vm1830_vm9, %v1791_v44 }
 0x26e   : > { %1667 = vst.msk [vmem:[#allocation2 + $0xe8] sm:$0xff] %vm1637_vm8, %v1600_v43 }
 0x270   : > { %v3254_v47 = vpop.f32.mrb[14].mxu0  ;;  %v1215_v1 = vpop.permute.xlu1 %1214 }
 0x271   : > { %v1024_v45 = vpop.permute.xlu0 %1023  ;;  %v2241_v48 = vmax.f32 %v3254_v47, 0.0  ;;  %v2137_v50 = vpop.f32.mrb[15].mxu0  ;;  %1281 = vst.msk [vmem:[#allocation2 + $0xf0] sm:$0xff] %vm1250_vm6, %v1215_v1  ;;  %v4353_v47 = vld [vmem:[#allocation3 + $0x48] sm:$0xff] }
 0x272   : > { %1089 = vst.msk [vmem:[#allocation2 + $0xf8] sm:$0xff] %vm1057_vm5, %v1024_v45  ;;  %v2240_v51 = vmax.f32 %v2137_v50, 0.0  ;;  %v4351_v45 = vld [vmem:[#allocation3 + $0x40] sm:$0xff] }
 0x273   : > { %2274 = vst.msk [vmem:[#allocation3 + $0x78] sm:$0xff] %vm2258_vm11, %v2241_v48  ;;  %v3321_v50 = vpack.c.bf16 %v4353_v47, %v4351_v45 }
 0x274   : > { %2273 = vst.msk [vmem:[#allocation3 + $0x70] sm:$0xff] %vm2258_vm11, %v2240_v51  ;;  %v1891_v7 = vld [vmem:[#allocation2 + $0xe0] sm:$0xff]  ;;  %v1217_v6 = vpop.permute.xlu1 %1216 }
 0x275   : > { %v1793_v35 = vpop.permute.xlu0 %1792  ;;  %3273 = vmatprep.mubr.msk.f32.mxu0 %vm1900_vm10, %v1891_v7  ;;  %1282 = vst.msk [vmem:[#allocation2 + $0xf8] sm:$0xff] %vm1250_vm6, %v1217_v6 }
 0x276   : > { %1860 = vst.msk [vmem:[#allocation2 + $0xe8] sm:$0xff] %vm1830_vm9, %v1793_v35 }
 0x278   : > { %v1411_v54 = vpop.permute.xlu1 %1410 }
 0x279   : > { %v1409_v53 = vpop.permute.xlu0 %1408  ;;  %1476 = vst.msk [vmem:[#allocation2 + $0xf8] sm:$0xff] %vm1444_vm7, %v1411_v54  ;;  %v4365_v54 = vld [vmem:[#allocation3 + $0x50] sm:$0xff] }
 0x27a   : > { %1475 = vst.msk [vmem:[#allocation2 + $0xf0] sm:$0xff] %vm1444_vm7, %v1409_v53 }
 0x27c   : > { %v1604_v58 = vpop.permute.xlu1 %1603 }
 0x27d   : > { %v1602_v56 = vpop.permute.xlu0 %1601  ;;  %v1892_v57 = vld [vmem:[#allocation2 + $0xe8] sm:$0xff]  ;;  %1669 = vst.msk [vmem:[#allocation2 + $0xf8] sm:$0xff] %vm1637_vm8, %v1604_v58 }
 0x27e   : > { %1668 = vst.msk [vmem:[#allocation2 + $0xf0] sm:$0xff] %vm1637_vm8, %v1602_v56  ;;  %3274 = vmatmul.mubr.msk.f32.gmra.mrb[28].mxu0 %vm1900_vm10, %v1892_v57  ;;  %v4367_v56 = vld [vmem:[#allocation3 + $0x58] sm:$0xff] }
 0x280   : > { %v1797_v61 = vpop.permute.xlu1 %1796 }
 0x281   : > { %v1795_v60 = vpop.permute.xlu0 %1794  ;;  %1862 = vst.msk [vmem:[#allocation2 + $0xf8] sm:$0xff] %vm1830_vm9, %v1797_v61 }
 0x282   : > { %1861 = vst.msk [vmem:[#allocation2 + $0xf0] sm:$0xff] %vm1830_vm9, %v1795_v60  ;;  %v3325_v60 = vpack.c.bf16 %v4367_v56, %v4365_v54 }
 0x288   : > { %v1894_v63 = vld [vmem:[#allocation2 + $0xf8] sm:$0xff] }
 0x289   : > { %v1893_v62 = vld [vmem:[#allocation2 + $0xf0] sm:$0xff] }
 0x28a   : > { %3276 = vmatprep.mubr.msk.f32.mxu0 %vm1900_vm10, %v1893_v62 }
 0x28b   : > { %3277 = vmatmul.mubr.msk.f32.gmra.mrb[30].mxu0 %vm1900_vm10, %v1894_v63 }
 0x290   : > { %v3257_v13 = vpop.f32.mrb[16].mxu0 }
 0x291   : > { %v2243_v12 = vmax.f32 %v3257_v13, 0.0  ;;  %v2147_v19 = vpop.f32.mrb[17].mxu0 }
 0x292   : > { %v2242_v0 = vmax.f32 %v2147_v19, 0.0  ;;  %v4379_v19 = vld [vmem:[#allocation3 + $0x60] sm:$0xff] }
 0x293   : > { %2276 = vst.msk [vmem:[#allocation3 + $0x88] sm:$0xff] %vm2258_vm11, %v2243_v12 }
 0x294   : > { %2275 = vst.msk [vmem:[#allocation3 + $0x80] sm:$0xff] %vm2258_vm11, %v2242_v0  ;;  %v4381_v0 = vld [vmem:[#allocation3 + $0x68] sm:$0xff] }
 0x29a   : > { %v4292_v39 = vld [vmem:[#allocation3 + $0x88] sm:$0xff] }
 0x29b   : > { %v4298_v4 = vld [vmem:[#allocation3 + $0x80] sm:$0xff] }
 0x29c   : > { %v3303_v5 = vpack.c.bf16 %v4292_v39, %v4298_v4 }
 0x29e   : > { %3304 = vmatprep.subr.bf16.mxu1 %v3303_v5 }
 0x29f   : > { %3306 = vmatpush3.bf16.msra.mxu1 %v3305_v8 }
 0x2b0   : > { %v3260_v9 = vpop.f32.mrb[18].mxu0 }
 0x2b1   : > { %v2245_v10 = vmax.f32 %v3260_v9, 0.0  ;;  %v2157_v11 = vpop.f32.mrb[19].mxu0 }
 0x2b2   : > { %v2244_v25 = vmax.f32 %v2157_v11, 0.0 }
 0x2b3   : > { %2278 = vst.msk [vmem:[#allocation3 + $0x98] sm:$0xff] %vm2258_vm11, %v2245_v10  ;;  %v3329_v10 = vpack.c.bf16 %v4381_v0, %v4379_v19 }
 0x2b4   : > { %2277 = vst.msk [vmem:[#allocation3 + $0x90] sm:$0xff] %vm2258_vm11, %v2244_v25 }
 0x2ba   : > { %v4306_v41 = vld [vmem:[#allocation3 + $0x98] sm:$0xff] }
 0x2bb   : > { %v4312_v15 = vld [vmem:[#allocation3 + $0x90] sm:$0xff] }
 0x2bc   : > { %v3307_v16 = vpack.c.bf16 %v4306_v41, %v4312_v15 }
 0x2be   : > { %3308 = vmatprep.subr.bf16.mxu1 %v3307_v16 }
 0x2bf   : > { %3310 = vmatpush3.bf16.msra.mxu1 %v3309_v17 }
 0x2d0   : > { %v3263_v18 = vpop.f32.mrb[20].mxu0 }
 0x2d1   : > { %v2247_v20 = vmax.f32 %v3263_v18, 0.0  ;;  %v2167_v21 = vpop.f32.mrb[21].mxu0  ;;  %v4393_v18 = vld [vmem:[#allocation3 + $0x70] sm:$0xff] }
 0x2d2   : > { %v2246_v22 = vmax.f32 %v2167_v21, 0.0 }
 0x2d3   : > { %2280 = vst.msk [vmem:[#allocation3 + $0xa8] sm:$0xff] %vm2258_vm11, %v2247_v20  ;;  %v4395_v20 = vld [vmem:[#allocation3 + $0x78] sm:$0xff] }
 0x2d4   : > { %2279 = vst.msk [vmem:[#allocation3 + $0xa0] sm:$0xff] %vm2258_vm11, %v2246_v22 }
 0x2da   : > { %v4320_v23 = vld [vmem:[#allocation3 + $0xa8] sm:$0xff] }
 0x2db   : > { %v4326_v49 = vld [vmem:[#allocation3 + $0xa0] sm:$0xff] }
 0x2dc   : > { %v3311_v46 = vpack.c.bf16 %v4320_v23, %v4326_v49 }
 0x2de   : > { %3312 = vmatprep.subr.bf16.mxu1 %v3311_v46  ;;  %v3333_v46 = vpack.c.bf16 %v4395_v20, %v4393_v18 }
 0x2df   : > { %3314 = vmatpush3.bf16.msra.mxu1 %v3313_v26  ;;  %v2398_v26 = vld [vmem:[%s4649_s2] sm:$0xf] }
 0x2f0   : > { %v3266_v28 = vpop.f32.mrb[22].mxu0 }
 0x2f1   : > { %v2249_v29 = vmax.f32 %v3266_v28, 0.0  ;;  %v2177_v30 = vpop.f32.mrb[23].mxu0  ;;  %v3388_v28 = vmov 0.0  }
 0x2f2   : > { %v2248_v32 = vmax.f32 %v2177_v30, 0.0 }
 0x2f3   : > { %2282 = vst.msk [vmem:[#allocation3 + $0xb8] sm:$0xff] %vm2258_vm11, %v2249_v29  ;;  %v3390_v29 = vmov 0.0|0.0  }
 0x2f4   : > { %2281 = vst.msk [vmem:[#allocation3 + $0xb0] sm:$0xff] %vm2258_vm11, %v2248_v32 }
 0x2fa   : > { %v4335_v34 = vld [vmem:[#allocation3 + $0xb8] sm:$0xff] }
 0x2fb   : > { %v4341_v55 = vld [vmem:[#allocation3 + $0xb0] sm:$0xff] }
 0x2fc   : > { %v3315_v52 = vpack.c.bf16 %v4335_v34, %v4341_v55 }
 0x2fe   : > { %3316 = vmatprep.subr.bf16.mxu1 %v3315_v52 }
 0x2ff   : > { %3318 = vmatpush3.bf16.msra.mxu1 %v3317_v38  ;;  %v2478_v38 = vld [vmem:[%s4651_s4 + $0x8] sm:$0xff] }
 0x310   : > { %v3269_v33 = vpop.f32.mrb[24].mxu0 }
 0x311   : > { %v2251_v59 = vmax.f32 %v3269_v33, 0.0  ;;  %v2187_v42 = vpop.f32.mrb[25].mxu0 }
 0x312   : > { %v2250_v43 = vmax.f32 %v2187_v42, 0.0 }
 0x313   : > { %2284 = vst.msk [vmem:[#allocation3 + $0xc8] sm:$0xff] %vm2258_vm11, %v2251_v59 }
 0x314   : > { %2283 = vst.msk [vmem:[#allocation3 + $0xc0] sm:$0xff] %vm2258_vm11, %v2250_v43  ;;  %v2479_v43 = vld [vmem:[%s4651_s4 + $0x10] sm:$0xff] }
 0x31a   : > { %v4349_v44 = vld [vmem:[#allocation3 + $0xc8] sm:$0xff] }
 0x31b   : > { %v4355_v48 = vld [vmem:[#allocation3 + $0xc0] sm:$0xff] }
 0x31c   : > { %v3319_v1 = vpack.c.bf16 %v4349_v44, %v4355_v48 }
 0x31e   : > { %3320 = vmatprep.subr.bf16.mxu1 %v3319_v1  ;;  %v2480_v1 = vld [vmem:[%s4651_s4 + $0x18] sm:$0xff] }
 0x31f   : > { %3322 = vmatpush3.bf16.msra.mxu1 %v3321_v50  ;;  %v3339_v50 = vpack.c.bf16 %v2480_v1, %v2479_v43 }
 0x330   : > { %v3272_v51 = vpop.f32.mrb[26].mxu0 }
 0x331   : > { %v2253_v35 = vmax.f32 %v3272_v51, 0.0  ;;  %v2197_v7 = vpop.f32.mrb[27].mxu0  ;;  %v2399_v51 = vld [vmem:[%s4650_s3] sm:$0x1] }
 0x332   : > { %v2252_v6 = vmax.f32 %v2197_v7, 0.0 }
 0x333   : > { %2286 = vst.msk [vmem:[#allocation3 + $0xd8] sm:$0xff] %vm2258_vm11, %v2253_v35 }
 0x334   : > { %2285 = vst.msk [vmem:[#allocation3 + $0xd0] sm:$0xff] %vm2258_vm11, %v2252_v6 }
 0x33a   : > { %v4363_v53 = vld [vmem:[#allocation3 + $0xd8] sm:$0xff] }
 0x33b   : > { %v4369_v57 = vld [vmem:[#allocation3 + $0xd0] sm:$0xff] }
 0x33c   : > { %v3323_v58 = vpack.c.bf16 %v4363_v53, %v4369_v57 }
 0x33e   : > { %3324 = vmatprep.subr.bf16.mxu1 %v3323_v58 }
 0x33f   : > { %3326 = vmatpush3.bf16.msra.mxu1 %v3325_v60  ;;  %v2481_v60 = vld [vmem:[%s4652_s5] sm:$0x1] }
 0x351   : > { %v3275_v61 = vpop.f32.mrb[28].mxu0 }
 0x352   : > { %v2255_v62 = vmax.f32 %v3275_v61, 0.0  ;;  %v2207_v63 = vpop.f32.mrb[29].mxu0 }
 0x353   : > { %v2254_v13 = vmax.f32 %v2207_v63, 0.0 }
 0x354   : > { %2288 = vst.msk [vmem:[#allocation3 + $0xe8] sm:$0xff] %vm2258_vm11, %v2255_v62 }
 0x355   : > { %2287 = vst.msk [vmem:[#allocation3 + $0xe0] sm:$0xff] %vm2258_vm11, %v2254_v13 }
 0x35b   : > { %v4377_v12 = vld [vmem:[#allocation3 + $0xe8] sm:$0xff] }
 0x35c   : > { %v4383_v5 = vld [vmem:[#allocation3 + $0xe0] sm:$0xff] }
 0x35d   : > { %v3327_v8 = vpack.c.bf16 %v4377_v12, %v4383_v5 }
 0x35e   : > { %v3278_v9 = vpop.f32.mrb[30].mxu0 }
 0x35f   : > { %v2257_v11 = vmax.f32 %v3278_v9, 0.0  ;;  %v2217_v25 = vpop.f32.mrb[31].mxu0  ;;  %3328 = vmatprep.subr.bf16.mxu1 %v3327_v8 }
 0x360   : > { %v2256_v16 = vmax.f32 %v2217_v25, 0.0  ;;  %3330 = vmatpush3.bf16.msra.mxu1 %v3329_v10 }
 0x361   : > { %2290 = vst.msk [vmem:[#allocation3 + $0xf8] sm:$0xff] %vm2258_vm11, %v2257_v11 }
 0x362   : > { %2289 = vst.msk [vmem:[#allocation3 + $0xf0] sm:$0xff] %vm2258_vm11, %v2256_v16 }
 0x368   : > { %v4391_v17 = vld [vmem:[#allocation3 + $0xf8] sm:$0xff] }
 0x369   : > { %v4397_v21 = vld [vmem:[#allocation3 + $0xf0] sm:$0xff] }
 0x36a   : > { %v3331_v22 = vpack.c.bf16 %v4391_v17, %v4397_v21 }
 0x36c   : > { %3332 = vmatprep.subr.bf16.mxu1 %v3331_v22 }
 0x36d   : > { %3334 = vmatpush3.bf16.msra.mxu1 %v3333_v46 }
 0x36e   : > { %3279 = vmatprep.subr.mxu1 %v3388_v28 }
 0x370   : > { %2388 = vmatmul.mubr.f32.vlgmr.msra.gmra.mrb[0].mxu1 %v3387_v27  ;;  %v2477_v27 = vld [vmem:[%s4651_s4] sm:$0xff] }
 0x371   : > { %3280 = vmatpush3.msk.msra.mxu1 %vm1997_vm1, %v2398_v26  ;;  %3281 = vmatprep.mubr.msk.f32.mxu1 %vm3389_vm12, %v3388_v28  ;;  %v3336_v59 = vpack.c.bf16 %v2478_v38, %v2477_v27 }
 0x372   : > { %3335 = vmatprep.subr.bf16.mxu1 %v3390_v29 }
 0x443   : > { %v3211_v30 = vpop.f32.mrb[0].mxu1 }
 0x444   : > { %v3212_v32 = vpop.f32.mrb[1].mxu1 }
 0x445   : > { %v3213_v52 = vadd.f32 %v3212_v32, %v3211_v30 }
 0x447   : > { %2394 = vrot.lane.b32.xlu0 %v3213_v52, %s3391_s25 }
 0x4b9   : > { %v2395_v33 = vpop.permute.xlu0 %2394 }
 0x4ba   : > { %v2397_v42 = vadd.f32 %v3213_v52, %v2395_v33  ;;  %v2584_v52 = vlaneseq }
 0x4bc   : > { %3282 = vmatmul.mubr.msk.f32.vlgmr.msra.gmra.mrb[2].mxu1 %vm284_vm0, %v2397_v42  ;;  %v4436_v27 = vshrl.u32 %v2584_v52, 7 }
 0x4bd   : > { %3337 = vmatpush3.bf16.msra.mxu1 %v3336_v59  ;;  %3292 = vmatprep.mubr.msk.f32.mxu1 %vm3389_vm12, %v3388_v28 }
 0x4be   : > { %3338 = vmatprep.subr.bf16.mxu1 %v3390_v29  ;;  %v2586_v33 = vsub.s32 0, %v4436_v27 }
 0x4c1   : > { %3340 = vmatpush3.bf16.msra.mxu1 %v3339_v50 }
 0x58f   : > { %v2472_v35 = vpop.f32.mrb[2].mxu1 }
 0x590   : > { %v2473_v7 = vadd.f32 %v2472_v35, %v2399_v51  ;;  %v3283_v6 = vpop.f32.mrb[3].mxu1 }
 0x592   : > { %v2476_v58 = vmax.f32 %v2473_v7, 0.0 }
 0x594   : > { %3293 = vmatmul.mubr.msk.f32.vlgmr.msra.gmra.mrb[4].mxu1 %vm2482_vm13, %v2476_v58 }
 0x667   : > { %v2552_v61 = vpop.f32.mrb[4].mxu1 }
 0x668   : > { %v2553_v62 = vadd.f32 %v2552_v61, %v2481_v60  ;;  %v3294_v63 = vpop.f32.mrb[5].mxu1 }
 0x66a   : > { %2557 = vrot.lane.b32.xlu1 %v2553_v62, %s3391_s25 }
 0x6dc   : > { %v2558_v13 = vpop.permute.xlu1 %2557 }
 0x6dd   : > { %v2560_v8 = vmax.f32 %v2553_v62, %v2558_v13 }
 0x6df   : > { %2565 = vrot.lane.b32.xlu0 %v2560_v8, %s3380_s28  ;;  %v2561_v16 = vsub.f32 %v2553_v62, %v2560_v8 }
 0x6e1   : > { %v2562_v22 = vmul.f32 1.442695, %v2561_v16 }
 0x751   : > { %v2566_v9 = vpop.permute.xlu0 %2565 }
 0x752   : > { %v2568_v10 = vsub.f32 %v2553_v62, %v2566_v9 }
 0x754   : > { %v2569_v11 = vmul.f32 1.442695, %v2568_v10 }
 0x756   : > { %3363 = vpow2.f32 %v2569_v11 }
 0x757   : > { %3365 = vpow2.f32 %v2562_v22 }
 0x760   : > { %v3364_v25 = vpop.eup %3363 }
 0x761   : > { %2572 = vrot.lane.b32.xlu1 %v3364_v25, %s3391_s25  ;;  %v3366_v46 = vpop.eup %3365 }
 0x7d3   : > { %v2573_v26 = vpop.permute.xlu1 %2572 }
 0x7d4   : > { %v2575_v28 = vadd.f32 %v3366_v46, %v2573_v26 }
 0x7d6   : > { %3367 = vrcp.f32 %v2575_v28  ;;  %2579 = vrot.lane.b32.xlu0 %v2575_v28, %s3380_s28  ;;  %s3141_s28 = sshll.u32 %s4655_s22, 8 }
 0x7d7   : > { %s4518_s17 = scalar_lea.vmem %s4653_s6, %s3141_s28 }
 0x7e0   : > { %v3368_v29 = vpop.eup %3367 }
 0x7e1   : > { %v4434_v30 = vmul.f32 %v3368_v29, %v3366_v46 }
 0x848   : > { %v2580_v32 = vpop.permute.xlu0 %2579 }
 0x849   : > { %3369 = vrcp.f32 %v2580_v32 }
 0x853   : > { %v3370_v38 = vpop.eup %3369 }
 0x854   : > { %v2583_v59 = vmul.f32 %v3370_v38, %v3364_v25 }
 0x856   : > { %v2623_v42 = vrot.slane %v2583_v59, %v2586_v33 }
 0x858   : > { %v2624_v43 = vmul.f32 %v2623_v42, %v4294_v2  ;;  %v2625_v1 = vmul.f32 %v2623_v42, %v4296_v3  ;;  %v2627_v50 = vmul.f32 %v2623_v42, %v4310_v14  ;;  %v2626_v51 = vmul.f32 %v2623_v42, %v4308_v31 }
 0x859   : > { %v2629_v35 = vmul.f32 %v2623_v42, %v4324_v24  ;;  %v2628_v7 = vmul.f32 %v2623_v42, %v4322_v40  ;;  %v2631_v6 = vmul.f32 %v2623_v42, %v4339_v37  ;;  %v2630_v58 = vmul.f32 %v2623_v42, %v4337_v36 }
 0x85a   : > { %2690 = vrot.lane.b32.xlu0 %v2625_v1, %s3391_s25  ;;  %2688 = vrot.lane.b32.xlu1 %v2624_v43, %s3391_s25  ;;  %v2633_v60 = vmul.f32 %v2623_v42, %v4353_v47  ;;  %v2632_v61 = vmul.f32 %v2623_v42, %v4351_v45  ;;  %v2635_v62 = vmul.f32 %v2623_v42, %v4367_v56 }
 0x85b   : > { %v2634_v63 = vmul.f32 %v2623_v42, %v4365_v54  ;;  %v2637_v13 = vmul.f32 %v2623_v42, %v4381_v0  ;;  %v2636_v8 = vmul.f32 %v2623_v42, %v4379_v19  ;;  %v2639_v9 = vmul.f32 %v2623_v42, %v4395_v20 }
 0x85c   : > { %v2638_v10 = vmul.f32 %v2623_v42, %v4393_v18  ;;  %v2640_v11 = vmul.f32 %v2623_v42, %v4298_v4  ;;  %v2641_v25 = vmul.f32 %v2623_v42, %v4292_v39  ;;  %v2643_v16 = vmul.f32 %v2623_v42, %v4306_v41 }
 0x85d   : > { %v2642_v22 = vmul.f32 %v2623_v42, %v4312_v15  ;;  %v2645_v46 = vmul.f32 %v2623_v42, %v4320_v23  ;;  %v2644_v26 = vmul.f32 %v2623_v42, %v4326_v49  ;;  %v2647_v28 = vmul.f32 %v2623_v42, %v4335_v34 }
 0x85e   : > { %2694 = vrot.lane.b32.xlu0 %v2627_v50, %s3391_s25  ;;  %2692 = vrot.lane.b32.xlu1 %v2626_v51, %s3391_s25  ;;  %v2646_v29 = vmul.f32 %v2623_v42, %v4341_v55  ;;  %v2649_v32 = vmul.f32 %v2623_v42, %v4349_v44  ;;  %v2648_v52 = vmul.f32 %v2623_v42, %v4355_v48 }
 0x85f   : > { %v2651_v38 = vmul.f32 %v2623_v42, %v4363_v53  ;;  %v2650_v59 = vmul.f32 %v2623_v42, %v4369_v57  ;;  %v2653_v43 = vmul.f32 %v2623_v42, %v4377_v12  ;;  %v2652_v1 = vmul.f32 %v2623_v42, %v4383_v5 }
 0x860   : > { %v2655_v50 = vmul.f32 %v2623_v42, %v4391_v17  ;;  %v2654_v51 = vmul.f32 %v2623_v42, %v4397_v21 }
 0x862   : > { %2698 = vrot.lane.b32.xlu0 %v2629_v35, %s3391_s25  ;;  %2696 = vrot.lane.b32.xlu1 %v2628_v7, %s3391_s25  ;;  %v4508_v35 = vrot.slane %v4434_v30, %v2586_v33 }
 0x864   : > { %v2589_v7 = vmul.f32 %v4508_v35, %v4296_v3  ;;  %v2590_v3 = vmul.f32 %v4508_v35, %v4308_v31 }
 0x866   : > { %2702 = vrot.lane.b32.xlu0 %v2631_v6, %s3391_s25  ;;  %2700 = vrot.lane.b32.xlu1 %v2630_v58, %s3391_s25  ;;  %v2588_v6 = vmul.f32 %v4508_v35, %v4294_v2  ;;  %v2591_v2 = vmul.f32 %v4508_v35, %v4310_v14 }
 0x86a   : > { %2706 = vrot.lane.b32.xlu0 %v2633_v60, %s3391_s25  ;;  %2704 = vrot.lane.b32.xlu1 %v2632_v61, %s3391_s25 }
 0x86e   : > { %2710 = vrot.lane.b32.xlu0 %v2635_v62, %s3391_s25  ;;  %2708 = vrot.lane.b32.xlu1 %v2634_v63, %s3391_s25  ;;  %v2593_v63 = vmul.f32 %v4508_v35, %v4324_v24 }
 0x872   : > { %2714 = vrot.lane.b32.xlu0 %v2637_v13, %s3391_s25  ;;  %2712 = vrot.lane.b32.xlu1 %v2636_v8, %s3391_s25  ;;  %v2592_v13 = vmul.f32 %v4508_v35, %v4322_v40 }
 0x876   : > { %2718 = vrot.lane.b32.xlu0 %v2639_v9, %s3391_s25  ;;  %2716 = vrot.lane.b32.xlu1 %v2638_v10, %s3391_s25  ;;  %v2595_v10 = vmul.f32 %v4508_v35, %v4339_v37 }
 0x87a   : > { %2722 = vrot.lane.b32.xlu0 %v2641_v25, %s3391_s25  ;;  %2720 = vrot.lane.b32.xlu1 %v2640_v11, %s3391_s25  ;;  %v2594_v11 = vmul.f32 %v4508_v35, %v4337_v36 }
 0x87e   : > { %2726 = vrot.lane.b32.xlu0 %v2643_v16, %s3391_s25  ;;  %2724 = vrot.lane.b32.xlu1 %v2642_v22, %s3391_s25  ;;  %v2597_v22 = vmul.f32 %v4508_v35, %v4353_v47 }
 0x882   : > { %2730 = vrot.lane.b32.xlu0 %v2645_v46, %s3391_s25  ;;  %2728 = vrot.lane.b32.xlu1 %v2644_v26, %s3391_s25  ;;  %v2596_v46 = vmul.f32 %v4508_v35, %v4351_v45 }
 0x886   : > { %2734 = vrot.lane.b32.xlu0 %v2647_v28, %s3391_s25  ;;  %2732 = vrot.lane.b32.xlu1 %v2646_v29, %s3391_s25  ;;  %v2599_v29 = vmul.f32 %v4508_v35, %v4367_v56 }
 0x88a   : > { %2738 = vrot.lane.b32.xlu0 %v2649_v32, %s3391_s25  ;;  %2736 = vrot.lane.b32.xlu1 %v2648_v52, %s3391_s25  ;;  %v2598_v32 = vmul.f32 %v4508_v35, %v4365_v54 }
 0x88e   : > { %2742 = vrot.lane.b32.xlu0 %v2651_v38, %s3391_s25  ;;  %2740 = vrot.lane.b32.xlu1 %v2650_v59, %s3391_s25  ;;  %v2601_v59 = vmul.f32 %v4508_v35, %v4381_v0 }
 0x892   : > { %2746 = vrot.lane.b32.xlu0 %v2653_v43, %s3391_s25  ;;  %2744 = vrot.lane.b32.xlu1 %v2652_v1, %s3391_s25  ;;  %v2600_v43 = vmul.f32 %v4508_v35, %v4379_v19 }
 0x896   : > { %2750 = vrot.lane.b32.xlu0 %v2655_v50, %s3391_s25  ;;  %2748 = vrot.lane.b32.xlu1 %v2654_v51, %s3391_s25  ;;  %v2603_v51 = vmul.f32 %v4508_v35, %v4395_v20 }
 0x8cc   : > { %v2691_v27 = vpop.permute.xlu0 %2690  ;;  %v2689_v42 = vpop.permute.xlu1 %2688 }
 0x8cd   : > { %v2785_v30 = vadd.f32 %v2691_v27, %v2589_v7  ;;  %v2784_v33 = vadd.f32 %v2689_v42, %v2588_v6  ;;  %v2602_v7 = vmul.f32 %v4508_v35, %v4393_v18  ;;  %v2605_v42 = vmul.f32 %v4508_v35, %v4292_v39 }
 0x8cf   : > { %2817 = vst.msk [vmem:[%s4518_s17 + $0x8] sm:$0xff] %vm284_vm0, %v2785_v30  ;;  %2816 = vst.msk [vmem:[%s4518_s17] sm:$0xff] %vm284_vm0, %v2784_v33  ;;  %v2604_v30 = vmul.f32 %v4508_v35, %v4298_v4 }
 0x8d0   : > { %v2695_v58 = vpop.permute.xlu0 %2694  ;;  %v2693_v60 = vpop.permute.xlu1 %2692 }
 0x8d1   : > { %v2787_v61 = vadd.f32 %v2695_v58, %v2591_v2  ;;  %v2786_v62 = vadd.f32 %v2693_v60, %v2590_v3  ;;  %v2607_v3 = vmul.f32 %v4508_v35, %v4306_v41  ;;  %v2606_v58 = vmul.f32 %v4508_v35, %v4312_v15 }
 0x8d3   : > { %2819 = vst.msk [vmem:[%s4518_s17 + $0x18] sm:$0xff] %vm284_vm0, %v2787_v61  ;;  %2818 = vst.msk [vmem:[%s4518_s17 + $0x10] sm:$0xff] %vm284_vm0, %v2786_v62  ;;  %v2609_v62 = vmul.f32 %v4508_v35, %v4320_v23 }
 0x8d4   : > { %v2699_v14 = vpop.permute.xlu0 %2698  ;;  %v2697_v8 = vpop.permute.xlu1 %2696 }
 0x8d5   : > { %v2789_v9 = vadd.f32 %v2699_v14, %v2593_v63  ;;  %v2788_v31 = vadd.f32 %v2697_v8, %v2592_v13  ;;  %v2608_v63 = vmul.f32 %v4508_v35, %v4326_v49  ;;  %v2611_v8 = vmul.f32 %v4508_v35, %v4335_v34 }
 0x8d7   : > { %2821 = vst.msk [vmem:[%s4518_s17 + $0x28] sm:$0xff] %vm284_vm0, %v2789_v9  ;;  %2820 = vst.msk [vmem:[%s4518_s17 + $0x20] sm:$0xff] %vm284_vm0, %v2788_v31  ;;  %v2610_v9 = vmul.f32 %v4508_v35, %v4341_v55 }
 0x8d8   : > { %v2703_v24 = vpop.permute.xlu0 %2702  ;;  %v2701_v25 = vpop.permute.xlu1 %2700 }
 0x8d9   : > { %v2791_v16 = vadd.f32 %v2703_v24, %v2595_v10  ;;  %v2790_v40 = vadd.f32 %v2701_v25, %v2594_v11  ;;  %v2613_v11 = vmul.f32 %v4508_v35, %v4349_v44  ;;  %v2612_v24 = vmul.f32 %v4508_v35, %v4355_v48 }
 0x8db   : > { %2823 = vst.msk [vmem:[%s4518_s17 + $0x38] sm:$0xff] %vm284_vm0, %v2791_v16  ;;  %2822 = vst.msk [vmem:[%s4518_s17 + $0x30] sm:$0xff] %vm284_vm0, %v2790_v40  ;;  %v2615_v40 = vmul.f32 %v4508_v35, %v4363_v53 }
 0x8dc   : > { %v2707_v37 = vpop.permute.xlu0 %2706  ;;  %v2705_v26 = vpop.permute.xlu1 %2704 }
 0x8dd   : > { %v2793_v28 = vadd.f32 %v2707_v37, %v2597_v22  ;;  %v2792_v36 = vadd.f32 %v2705_v26, %v2596_v46  ;;  %v2614_v22 = vmul.f32 %v4508_v35, %v4369_v57  ;;  %v2617_v26 = vmul.f32 %v4508_v35, %v4377_v12 }
 0x8df   : > { %2825 = vst.msk [vmem:[%s4518_s17 + $0x48] sm:$0xff] %vm284_vm0, %v2793_v28  ;;  %2824 = vst.msk [vmem:[%s4518_s17 + $0x40] sm:$0xff] %vm284_vm0, %v2792_v36  ;;  %v2616_v28 = vmul.f32 %v4508_v35, %v4383_v5 }
 0x8e0   : > { %v2711_v47 = vpop.permute.xlu0 %2710  ;;  %v2709_v52 = vpop.permute.xlu1 %2708 }
 0x8e1   : > { %v2795_v38 = vadd.f32 %v2711_v47, %v2599_v29  ;;  %v2794_v45 = vadd.f32 %v2709_v52, %v2598_v32  ;;  %v2619_v32 = vmul.f32 %v4508_v35, %v4391_v17  ;;  %v2618_v47 = vmul.f32 %v4508_v35, %v4397_v21 }
 0x8e3   : > { %2827 = vst.msk [vmem:[%s4518_s17 + $0x58] sm:$0xff] %vm284_vm0, %v2795_v38  ;;  %2826 = vst.msk [vmem:[%s4518_s17 + $0x50] sm:$0xff] %vm284_vm0, %v2794_v45 }
 0x8e4   : > { %v2715_v56 = vpop.permute.xlu0 %2714  ;;  %v2713_v1 = vpop.permute.xlu1 %2712 }
 0x8e5   : > { %v2797_v50 = vadd.f32 %v2715_v56, %v2601_v59  ;;  %v2796_v54 = vadd.f32 %v2713_v1, %v2600_v43 }
 0x8e7   : > { %2829 = vst.msk [vmem:[%s4518_s17 + $0x68] sm:$0xff] %vm284_vm0, %v2797_v50  ;;  %2828 = vst.msk [vmem:[%s4518_s17 + $0x60] sm:$0xff] %vm284_vm0, %v2796_v54 }
 0x8e8   : > { %v2719_v0 = vpop.permute.xlu0 %2718  ;;  %v2717_v6 = vpop.permute.xlu1 %2716 }
 0x8e9   : > { %v2799_v27 = vadd.f32 %v2719_v0, %v2603_v51  ;;  %v2798_v19 = vadd.f32 %v2717_v6, %v2602_v7 }
 0x8eb   : > { %2831 = vst.msk [vmem:[%s4518_s17 + $0x78] sm:$0xff] %vm284_vm0, %v2799_v27  ;;  %2830 = vst.msk [vmem:[%s4518_s17 + $0x70] sm:$0xff] %vm284_vm0, %v2798_v19 }
 0x8ec   : > { %v2723_v20 = vpop.permute.xlu0 %2722  ;;  %v2721_v33 = vpop.permute.xlu1 %2720 }
 0x8ed   : > { %v2801_v2 = vadd.f32 %v2723_v20, %v2605_v42  ;;  %v2800_v18 = vadd.f32 %v2721_v33, %v2604_v30 }
 0x8ef   : > { %2833 = vst.msk [vmem:[%s4518_s17 + $0x88] sm:$0xff] %vm284_vm0, %v2801_v2  ;;  %2832 = vst.msk [vmem:[%s4518_s17 + $0x80] sm:$0xff] %vm284_vm0, %v2800_v18 }
 0x8f0   : > { %v2727_v39 = vpop.permute.xlu0 %2726  ;;  %v2725_v60 = vpop.permute.xlu1 %2724 }
 0x8f1   : > { %v2803_v61 = vadd.f32 %v2727_v39, %v2607_v3  ;;  %v2802_v4 = vadd.f32 %v2725_v60, %v2606_v58 }
 0x8f3   : > { %2835 = vst.msk [vmem:[%s4518_s17 + $0x98] sm:$0xff] %vm284_vm0, %v2803_v61  ;;  %2834 = vst.msk [vmem:[%s4518_s17 + $0x90] sm:$0xff] %vm284_vm0, %v2802_v4 }
 0x8f4   : > { %v2731_v41 = vpop.permute.xlu0 %2730  ;;  %v2729_v13 = vpop.permute.xlu1 %2728 }
 0x8f5   : > { %v2805_v14 = vadd.f32 %v2731_v41, %v2609_v62  ;;  %v2804_v15 = vadd.f32 %v2729_v13, %v2608_v63 }
 0x8f7   : > { %2837 = vst.msk [vmem:[%s4518_s17 + $0xa8] sm:$0xff] %vm284_vm0, %v2805_v14  ;;  %2836 = vst.msk [vmem:[%s4518_s17 + $0xa0] sm:$0xff] %vm284_vm0, %v2804_v15 }
 0x8f8   : > { %v2735_v23 = vpop.permute.xlu0 %2734  ;;  %v2733_v31 = vpop.permute.xlu1 %2732 }
 0x8f9   : > { %v2807_v10 = vadd.f32 %v2735_v23, %v2611_v8  ;;  %v2806_v49 = vadd.f32 %v2733_v31, %v2610_v9 }
 0x8fb   : > { %2839 = vst.msk [vmem:[%s4518_s17 + $0xb8] sm:$0xff] %vm284_vm0, %v2807_v10  ;;  %2838 = vst.msk [vmem:[%s4518_s17 + $0xb0] sm:$0xff] %vm284_vm0, %v2806_v49 }
 0x8fc   : > { %v2739_v34 = vpop.permute.xlu0 %2738  ;;  %v2737_v25 = vpop.permute.xlu1 %2736 }
 0x8fd   : > { %v2809_v16 = vadd.f32 %v2739_v34, %v2613_v11  ;;  %v2808_v55 = vadd.f32 %v2737_v25, %v2612_v24 }
 0x8ff   : > { %2841 = vst.msk [vmem:[%s4518_s17 + $0xc8] sm:$0xff] %vm284_vm0, %v2809_v16  ;;  %2840 = vst.msk [vmem:[%s4518_s17 + $0xc0] sm:$0xff] %vm284_vm0, %v2808_v55 }
 0x900   : > { %v2743_v44 = vpop.permute.xlu0 %2742  ;;  %v2741_v46 = vpop.permute.xlu1 %2740 }
 0x901   : > { %v2811_v37 = vadd.f32 %v2743_v44, %v2615_v40  ;;  %v2810_v48 = vadd.f32 %v2741_v46, %v2614_v22 }
 0x903   : > { %2843 = vst.msk [vmem:[%s4518_s17 + $0xd8] sm:$0xff] %vm284_vm0, %v2811_v37  ;;  %2842 = vst.msk [vmem:[%s4518_s17 + $0xd0] sm:$0xff] %vm284_vm0, %v2810_v48 }
 0x904   : > { %v2747_v53 = vpop.permute.xlu0 %2746  ;;  %v2745_v36 = vpop.permute.xlu1 %2744 }
 0x905   : > { %v2813_v29 = vadd.f32 %v2747_v53, %v2617_v26  ;;  %v2812_v57 = vadd.f32 %v2745_v36, %v2616_v28 }
 0x907   : > { %2845 = vst.msk [vmem:[%s4518_s17 + $0xe8] sm:$0xff] %vm284_vm0, %v2813_v29  ;;  %2844 = vst.msk [vmem:[%s4518_s17 + $0xe0] sm:$0xff] %vm284_vm0, %v2812_v57 }
 0x908   : > { %v2751_v52 = vpop.permute.xlu0 %2750  ;;  %v2749_v38 = vpop.permute.xlu1 %2748 }
 0x909   : > { %v2815_v12 = vadd.f32 %v2751_v52, %v2619_v32  ;;  %v2814_v45 = vadd.f32 %v2749_v38, %v2618_v47 }
 0x90b   : > { %2847 = vst.msk [vmem:[%s4518_s17 + $0xf8] sm:$0xff] %vm284_vm0, %v2815_v12  ;;  %2846 = vst.msk [vmem:[%s4518_s17 + $0xf0] sm:$0xff] %vm284_vm0, %v2814_v45 }
 0x90c PF: > { %s16_s21 = sadd.s32 1, %s3377_s21  }
 0x90d   : > { %p13_p4 = scmp.ge.s32.totalorder %s16_s21, 4  }
 0x90f   :  { %15 = sbr.rel (!%p13_p4) target bundleno = 1 (0x1), region = 76 }

</bundles_post_ra>
